<compile_context>
chip_gen: v6e
topology: v6e:2x2x1
jax: 0.10.0
libtpu: 0.0.40
codegen_flags: <defaults>
</compile_context>

<pallas_src>
import math
import functools

import jax
import jax.numpy as jnp
from jax.experimental import pallas as pl
from jax.experimental.pallas import tpu as pltpu


# ----------------------------------------------------------------------------
# In-kernel helpers
# ----------------------------------------------------------------------------
def _layer_norm(x, gamma, beta, eps=1e-5):
    mu = jnp.mean(x, axis=-1, keepdims=True)
    var = jnp.mean((x - mu) ** 2, axis=-1, keepdims=True)
    return (x - mu) * jax.lax.rsqrt(var + eps) * gamma + beta


# ----------------------------------------------------------------------------
# Fused GPT encoder kernel: embedding combine (l == 0) + one EncoderBlock per
# grid step, activations resident in VMEM scratch, output stored at last step.
# ----------------------------------------------------------------------------
def _gpt_encoder_kernel(note_ref, vel_ref, time_ref, temb_ref, pos_ref, vl_ref,
                        wqkv_ref, wo_ref, w1_ref, w2_ref,
                        bqkv_ref, b1_ref, pack_ref,
                        out_ref,
                        x_sc, mask_sc,
                        *, num_heads, head_dim, bsz, seq, hidden,
                        compute_dtype):
    l = pl.program_id(0)
    nh, hd = num_heads, head_dim
    B, T, H = bsz, seq, hidden
    R = B * T
    HD = nh * hd
    cdt = compute_dtype

    # ---- step 0: fused embedding combine + hoisted key-mask construction ----
    @pl.when(l == 0)
    def _init():
        x0 = (note_ref[...] + vel_ref[...]
              + time_ref[...] * temb_ref[...]       # outer product time ⊗ temb
              + pos_ref[...])                       # (B, T, H)
        x_sc[...] = x0.reshape(R, H)
        vlen = vl_ref[...]                          # (B, 1) int32
        key_idx = jax.lax.broadcasted_iota(jnp.int32, (B, nh, T), 2)
        keep = jnp.where(key_idx < vlen.reshape(B, 1, 1), 1.0, 0.0)
        mask_sc[...] = keep.reshape(B * nh, T)      # reused across all layers

    x = x_sc[...]                                   # (R, H) f32, VMEM resident
    xc = x.astype(cdt)

    # ---- multi-head attention: fused QKV projection, heads batched ----------
    qkv = (jnp.dot(xc, wqkv_ref[0], preferred_element_type=jnp.float32)
           + bqkv_ref[0])                           # (R, 3*HD)
    q = qkv[:, 0 * HD:1 * HD] * (1.0 / math.sqrt(hd))   # fold 1/sqrt(d) into q
    k = qkv[:, 1 * HD:2 * HD]
    v = qkv[:, 2 * HD:3 * HD]

    def to_heads(t):                                # (R, HD) -> (B*nh, T, hd)
        t = t.reshape(B, T, nh, hd)
        t = jnp.transpose(t, (0, 2, 1, 3))
        return t.reshape(B * nh, T, hd)

    qh = to_heads(q).astype(cdt)
    kh = to_heads(k).astype(cdt)
    vh = to_heads(v).astype(cdt)

    scores = jnp.einsum('bqd,bkd->bqk', qh, kh,
                        preferred_element_type=jnp.float32)    # (B*nh, T, T)
    keep = mask_sc[...]                                        # (B*nh, T)
    scores = jnp.where(keep[:, None, :] != 0.0, scores, -1000000.0)

    smax = jnp.max(scores, axis=-1, keepdims=True)
    e = jnp.exp(scores - smax)
    probs = e * pl.reciprocal(jnp.sum(e, axis=-1, keepdims=True), approx=True)

    attn = jnp.einsum('bqk,bkd->bqd', probs.astype(cdt), vh,
                      preferred_element_type=jnp.float32)      # (B*nh, T, hd)
    attn = jnp.transpose(attn.reshape(B, nh, T, hd), (0, 2, 1, 3))
    attn = attn.reshape(R, HD)

    pack = pack_ref[0]                              # (6, H) f32
    bo, ln1g, ln1b, b2, ln2g, ln2b = [pack[i:i + 1] for i in range(6)]

    o = jnp.dot(attn.astype(cdt), wo_ref[0],
                preferred_element_type=jnp.float32) + bo       # (R, H)

    # ---- AddNorm 1 / position-wise FFN / AddNorm 2 (f32 elementwise) --------
    y = _layer_norm(o + x, ln1g, ln1b)
    h1 = jnp.maximum(
        jnp.dot(y.astype(cdt), w1_ref[0], preferred_element_type=jnp.float32)
        + b1_ref[0], 0.0)
    ffn = jnp.dot(h1.astype(cdt), w2_ref[0],
                  preferred_element_type=jnp.float32) + b2
    z = _layer_norm(ffn + y, ln2g, ln2b)

    x_sc[...] = z                                   # stays resident in VMEM

    @pl.when(l == pl.num_programs(0) - 1)
    def _store():
        out_ref[...] = z.reshape(B, T, H)


# ----------------------------------------------------------------------------
# Fused LM head kernel: three MLPs (Linear -> ReLU -> LayerNorm -> Linear) on
# the gathered prediction positions, in one launch.
# ----------------------------------------------------------------------------
def _lm_head_kernel(x_ref, win_ref, bpack_ref, wn_ref, bn_ref, wv_ref, bv_ref,
                    wt_ref, bt_ref,
                    note_ref, vel_ref, time_ref,
                    *, bsz, npred, compute_dtype):
    cdt = compute_dtype
    x = x_ref[...]                                  # (B*P, H_in) f32
    xc = x.astype(cdt)

    def mlp_hidden(i):                              # Linear -> ReLU -> LN, f32
        h = (jnp.dot(xc, win_ref[i], preferred_element_type=jnp.float32)
             + bpack_ref[i, 0:1])
        h = jnp.maximum(h, 0.0)
        return _layer_norm(h, bpack_ref[i, 1:2], bpack_ref[i, 2:3])

    hn = mlp_hidden(0)                              # note head hidden
    hv = mlp_hidden(1)                              # velocity head hidden
    ht = mlp_hidden(2)                              # time head hidden

    note = (jnp.dot(hn.astype(cdt), wn_ref[...],
                    preferred_element_type=jnp.float32) + bn_ref[...])
    vel = (jnp.dot(hv.astype(cdt), wv_ref[...],
                   preferred_element_type=jnp.float32) + bv_ref[...])
    # Time head has a single output column: use a lane reduce instead of a
    # degenerate N=1 matmul (weight is stored pre-transposed as (1, H)).
    tim = jnp.sum(ht * wt_ref[...], axis=-1, keepdims=True) + bt_ref[...]

    note_ref[...] = note.reshape(bsz, npred, -1)
    vel_ref[...] = vel.reshape(bsz, npred, -1)
    time_ref[...] = tim.reshape(bsz, npred, 1)


# ----------------------------------------------------------------------------
# Parameter construction (torch-like per-block layout) and one-time packing
# ----------------------------------------------------------------------------
def init_params(key, *, note_size, velocity_size, num_hiddens, num_heads,
                ffn_num_hiddens, num_layers, max_len):
    H = num_hiddens
    HD = num_hiddens * num_heads
    ks = jax.random.split(key, 5 + num_layers)

    def rnd(k, shape, scale=0.02):
        return (scale * jax.random.normal(k, shape)).astype(jnp.float32)

    params = {
        "note_emb": rnd(ks[0], (note_size, H), 1.0),
        "vel_emb": rnd(ks[1], (velocity_size, H), 1.0),
        "time_emb": rnd(ks[2], (1, H), 1.0),         # nn.Parameter (1,1,H)
        "pos_emb": rnd(ks[3], (max_len, H), 1.0),    # nn.Parameter (1,max_len,H)
        "blocks": [],
    }
    for i in range(num_layers):
        bk = jax.random.split(ks[4 + i], 12)
        blk = {
            # PyTorch Linear weights are (out, in); stored here pre-transposed.
            "wq": rnd(bk[0], (H, HD)), "bq": rnd(bk[1], (1, HD)),
            "wk": rnd(bk[2], (H, HD)), "bk": rnd(bk[3], (1, HD)),
            "wv": rnd(bk[4], (H, HD)), "bv": rnd(bk[5], (1, HD)),
            "wo": rnd(bk[6], (HD, H)), "bo": rnd(bk[7], (1, H)),
            "ln1_g": jnp.ones((1, H), jnp.float32),
            "ln1_b": jnp.zeros((1, H), jnp.float32),
            "w1": rnd(bk[8], (H, ffn_num_hiddens)),
            "b1": rnd(bk[9], (1, ffn_num_hiddens)),
            "w2": rnd(bk[10], (ffn_num_hiddens, H)),
            "b2": rnd(bk[11], (1, H)),
            "ln2_g": jnp.ones((1, H), jnp.float32),
            "ln2_b": jnp.zeros((1, H), jnp.float32),
        }
        params["blocks"].append(blk)

    # LM head (note / velocity / time MLPs), lm_in_features == num_hiddens.
    lk = jax.random.split(ks[4 + num_layers], 12)

    def lm_mlp(k1, k2, k3, k4, out_size):
        return {
            "w1": rnd(k1, (H, H)), "b1": rnd(k2, (1, H)),
            "ln_g": jnp.ones((1, H), jnp.float32),
            "ln_b": jnp.zeros((1, H), jnp.float32),
            "w2": rnd(k3, (H, out_size)), "b2": rnd(k4, (1, out_size)),
        }

    params["lm"] = {
        "note": lm_mlp(lk[0], lk[1], lk[2], lk[3], note_size),
        "velocity": lm_mlp(lk[4], lk[5], lk[6], lk[7], velocity_size),
        "time": lm_mlp(lk[8], lk[9], lk[10], lk[11], 1),
    }
    return params


def pack_params(params, compute_dtype=jnp.bfloat16):
    """Stack per-layer weights on a leading layer axis (matmul weights cast to
    compute_dtype), fuse QKV projections, and pack small per-layer vectors."""
    blks = params["blocks"]
    stack = lambda name: jnp.stack([b[name] for b in blks], axis=0)
    lm = params["lm"]
    lm_order = ("note", "velocity", "time")
    return {
        "note_emb": params["note_emb"],
        "vel_emb": params["vel_emb"],
        "time_emb": params["time_emb"],
        "pos_emb": params["pos_emb"],
        # Fused QKV: (L, H, 3*HD) weight, (L, 1, 3*HD) bias.
        "wqkv": jnp.stack(
            [jnp.concatenate([b["wq"], b["wk"], b["wv"]], axis=1)
             for b in blks], axis=0).astype(compute_dtype),
        "bqkv": jnp.stack(
            [jnp.concatenate([b["bq"], b["bk"], b["bv"]], axis=1)
             for b in blks], axis=0).astype(jnp.float32),
        "wo": stack("wo").astype(compute_dtype),     # (L, HD, H)
        "w1": stack("w1").astype(compute_dtype),     # (L, H, F)
        "w2": stack("w2").astype(compute_dtype),     # (L, F, H)
        "b1": stack("b1").astype(jnp.float32),       # (L, 1, F)
        "pack": jnp.stack(
            [jnp.concatenate([b["bo"], b["ln1_g"], b["ln1_b"],
                              b["b2"], b["ln2_g"], b["ln2_b"]], axis=0)
             for b in blks], axis=0).astype(jnp.float32),        # (L, 6, H)
        # LM head packing.
        "lm_win": jnp.stack([lm[k]["w1"] for k in lm_order],
                            axis=0).astype(compute_dtype),       # (3, H, H)
        "lm_bpack": jnp.stack(
            [jnp.concatenate([lm[k]["b1"], lm[k]["ln_g"], lm[k]["ln_b"]],
                             axis=0) for k in lm_order],
            axis=0).astype(jnp.float32),                         # (3, 3, H)
        "lm_wn": lm["note"]["w2"].astype(compute_dtype),         # (H, note)
        "lm_bn": lm["note"]["b2"].astype(jnp.float32),           # (1, note)
        "lm_wv": lm["velocity"]["w2"].astype(compute_dtype),     # (H, vel)
        "lm_bv": lm["velocity"]["b2"].astype(jnp.float32),       # (1, vel)
        "lm_wt": jnp.transpose(lm["time"]["w2"]).astype(jnp.float32),  # (1, H)
        "lm_bt": lm["time"]["b2"].astype(jnp.float32),           # (1, 1)
    }


# ----------------------------------------------------------------------------
# Forward wrappers
# ----------------------------------------------------------------------------
def gpt_encoder_forward(packed, tokens, valid_lens, *, num_heads, num_hiddens):
    note_ids, vel_ids, times = tokens
    B, T = note_ids.shape
    H = num_hiddens
    nh = num_heads
    hd = num_hiddens                       # per-head dim == num_hiddens
    HD = nh * hd
    L = packed["wqkv"].shape[0]
    F = packed["w1"].shape[2]
    cdt = packed["wqkv"].dtype

    # Embedding gathers are glue (table lookups) done in plain JAX.
    note_e = jnp.take(packed["note_emb"], note_ids, axis=0)
    vel_e = jnp.take(packed["vel_emb"], vel_ids, axis=0)
    pos_e = packed["pos_emb"][:T, :]
    times3 = times.reshape(B, T, 1).astype(jnp.float32)
    if valid_lens is None:                 # unmasked path == valid_len of T
        valid_lens = jnp.full((B,), T, dtype=jnp.int32)
    vl = valid_lens.reshape(B, 1).astype(jnp.int32)

    kernel = functools.partial(
        _gpt_encoder_kernel, num_heads=nh, head_dim=hd,
        bsz=B, seq=T, hidden=H, compute_dtype=cdt)

    const3 = lambda l: (0, 0, 0)
    const2 = lambda l: (0, 0)
    layer3 = lambda l: (l, 0, 0)

    return pl.pallas_call(
        kernel,
        out_shape=jax.ShapeDtypeStruct((B, T, H), jnp.float32),
        grid=(L,),
        in_specs=[
            pl.BlockSpec((B, T, H), const3),       # note embedding (l==0 only)
            pl.BlockSpec((B, T, H), const3),       # velocity embedding
            pl.BlockSpec((B, T, 1), const3),       # times
            pl.BlockSpec((1, H), const2),          # time_embedding param
            pl.BlockSpec((T, H), const2),          # positional embedding
            pl.BlockSpec((B, 1), const2),          # valid_lens
            pl.BlockSpec((1, H, 3 * HD), layer3),  # fused W_qkv (per layer)
            pl.BlockSpec((1, HD, H), layer3),      # W_o
            pl.BlockSpec((1, H, F), layer3),       # FFN W1
            pl.BlockSpec((1, F, H), layer3),       # FFN W2
            pl.BlockSpec((1, 1, 3 * HD), layer3),  # fused [bq|bk|bv]
            pl.BlockSpec((1, 1, F), layer3),       # b1
            pl.BlockSpec((1, 6, H), layer3),       # [bo; ln1; b2; ln2]
        ],
        out_specs=pl.BlockSpec((B, T, H), const3),
        scratch_shapes=[
            pltpu.VMEM((B * T, H), jnp.float32),   # resident activations
            pltpu.VMEM((B * nh, T), jnp.float32),  # hoisted key mask (0/1)
        ],
        compiler_params=pltpu.CompilerParams(
            dimension_semantics=("arbitrary",)),
    )(note_e, vel_e, times3, packed["time_emb"], pos_e, vl,
      packed["wqkv"], packed["wo"], packed["w1"], packed["w2"],
      packed["bqkv"], packed["b1"], packed["pack"])


def lm_forward(packed, encoded, pred_positions):
    B, T, H = encoded.shape
    P = pred_positions.shape[1]
    note_size = packed["lm_wn"].shape[1]
    velocity_size = packed["lm_wv"].shape[1]
    cdt = packed["lm_win"].dtype

    # Position gather (X[batch_idx, pred_positions]) is plain-JAX glue.
    batch_idx = jnp.arange(B, dtype=jnp.int32)[:, None]
    xg = encoded[batch_idx, pred_positions].reshape(B * P, H).astype(jnp.float32)

    kernel = functools.partial(_lm_head_kernel, bsz=B, npred=P,
                               compute_dtype=cdt)
    c2 = lambda i: (0, 0)
    c3 = lambda i: (0, 0, 0)

    return pl.pallas_call(
        kernel,
        out_shape=(jax.ShapeDtypeStruct((B, P, note_size), jnp.float32),
                   jax.ShapeDtypeStruct((B, P, velocity_size), jnp.float32),
                   jax.ShapeDtypeStruct((B, P, 1), jnp.float32)),
        grid=(1,),
        in_specs=[
            pl.BlockSpec((B * P, H), c2),                  # gathered positions
            pl.BlockSpec((3, H, H), c3),                   # stacked dense1 W
            pl.BlockSpec((3, 3, H), c3),                   # [b1; ln_g; ln_b]
            pl.BlockSpec((H, note_size), c2),              # note dense2 W
            pl.BlockSpec((1, note_size), c2),              # note dense2 b
            pl.BlockSpec((H, velocity_size), c2),          # velocity dense2 W
            pl.BlockSpec((1, velocity_size), c2),          # velocity dense2 b
            pl.BlockSpec((1, H), c2),                      # time dense2 W^T
            pl.BlockSpec((1, 1), c2),                      # time dense2 b
        ],
        out_specs=(pl.BlockSpec((B, P, note_size), c3),
                   pl.BlockSpec((B, P, velocity_size), c3),
                   pl.BlockSpec((B, P, 1), c3)),
    )(xg, packed["lm_win"], packed["lm_bpack"],
      packed["lm_wn"], packed["lm_bn"], packed["lm_wv"], packed["lm_bv"],
      packed["lm_wt"], packed["lm_bt"])


def gpt_model_forward(packed, tokens, valid_lens=None, pred_positions=None,
                      *, num_heads, num_hiddens):
    encoded = gpt_encoder_forward(packed, tokens, valid_lens,
                                  num_heads=num_heads, num_hiddens=num_hiddens)
    if pred_positions is not None:
        lm_note, lm_vel, lm_time = lm_forward(packed, encoded, pred_positions)
    else:
        lm_note, lm_vel, lm_time = None, None, None
    # TODO(synk): GPTModel.hidden (Linear+Tanh) is defined but never used in
    # the reference forward, so it is intentionally not translated.
    return encoded, lm_note, lm_vel, lm_time


# ----------------------------------------------------------------------------
# Demo / smoke test
# ----------------------------------------------------------------------------
if __name__ == "__main__":
    B, T = 2, 8
    note_size, velocity_size = 16, 16
    num_hiddens = 32          # model dim AND per-head dim (as in the module)
    num_heads = 4
    ffn_num_hiddens = 64
    num_layers = 2
    max_len = 16
    P = 3                     # prediction positions per sequence

    key = jax.random.PRNGKey(0)
    kp, k0, k1, k2 = jax.random.split(key, 4)

    params = init_params(kp, note_size=note_size, velocity_size=velocity_size,
                         num_hiddens=num_hiddens, num_heads=num_heads,
                         ffn_num_hiddens=ffn_num_hiddens,
                         num_layers=num_layers, max_len=max_len)
    packed = pack_params(params, compute_dtype=jnp.bfloat16)

    note_ids = jax.random.randint(k0, (B, T), 0, note_size, dtype=jnp.int32)
    vel_ids = jax.random.randint(k1, (B, T), 0, velocity_size, dtype=jnp.int32)
    times = jax.random.uniform(k2, (B, T), dtype=jnp.float32)
    valid_lens = jnp.array([T, 5], dtype=jnp.int32)
    pred_positions = jnp.array([[1, 3, 6], [0, 2, 4]], dtype=jnp.int32)

    # Full path: encoder + LM head on prediction positions.
    encoded, lm_note, lm_vel, lm_time = gpt_model_forward(
        packed, (note_ids, vel_ids, times), valid_lens, pred_positions,
        num_heads=num_heads, num_hiddens=num_hiddens)
    encoded = jax.block_until_ready(encoded)
    lm_note = jax.block_until_ready(lm_note)
    lm_vel = jax.block_until_ready(lm_vel)
    lm_time = jax.block_until_ready(lm_time)

    assert encoded.shape == (B, T, num_hiddens), encoded.shape
    assert lm_note.shape == (B, P, note_size), lm_note.shape
    assert lm_vel.shape == (B, P, velocity_size), lm_vel.shape
    assert lm_time.shape == (B, P, 1), lm_time.shape
    assert bool(jnp.all(jnp.isfinite(encoded)))
    assert bool(jnp.all(jnp.isfinite(lm_note)))
    assert bool(jnp.all(jnp.isfinite(lm_vel)))
    assert bool(jnp.all(jnp.isfinite(lm_time)))

    # pred_positions=None path: GPTModel returns (encoded, None, None, None).
    enc2, n2, v2, t2 = gpt_model_forward(
        packed, (note_ids, vel_ids, times), valid_lens, None,
        num_heads=num_heads, num_hiddens=num_hiddens)
    enc2 = jax.block_until_ready(enc2)
    assert enc2.shape == (B, T, num_hiddens)
    assert n2 is None and v2 is None and t2 is None

    print("KERNEL_OK")
</pallas_src>

<mosaic_0001>
module attributes {stable_mosaic.version = 11 : i64} {
  func.func @_gpt_encoder_kernel(%arg0: i32, %arg1: memref<2x8x32xf32, #tpu.memory_space<vmem>>, %arg2: memref<2x8x32xf32, #tpu.memory_space<vmem>>, %arg3: memref<2x8x1xf32, #tpu.memory_space<vmem>>, %arg4: memref<1x32xf32, #tpu.memory_space<vmem>>, %arg5: memref<8x32xf32, #tpu.memory_space<vmem>>, %arg6: memref<2x1xi32, #tpu.memory_space<vmem>>, %arg7: memref<1x32x384xbf16, #tpu.memory_space<vmem>>, %arg8: memref<1x128x32xbf16, #tpu.memory_space<vmem>>, %arg9: memref<1x32x64xbf16, #tpu.memory_space<vmem>>, %arg10: memref<1x64x32xbf16, #tpu.memory_space<vmem>>, %arg11: memref<1x1x384xf32, #tpu.memory_space<vmem>>, %arg12: memref<1x1x64xf32, #tpu.memory_space<vmem>>, %arg13: memref<1x6x32xf32, #tpu.memory_space<vmem>>, %arg14: memref<2x8x32xf32, #tpu.memory_space<vmem>>, %arg15: memref<16x32xf32, #tpu.memory_space<vmem>>, %arg16: memref<8x8xf32, #tpu.memory_space<vmem>>) attributes {dimension_semantics = [#tpu.dimension_semantics<arbitrary>], iteration_bounds = array<i64: 2>, scalar_prefetch = 0 : i64, scratch_operands = 2 : i64, tpu.core_type = #tpu.core_type<tc>, window_params = [{pipeline_mode = #tpu.pipeline_mode<synchronous>, transform_indices = @transform_0, window_bounds = array<i64: 2, 8, 32>}, {pipeline_mode = #tpu.pipeline_mode<synchronous>, transform_indices = @transform_1, window_bounds = array<i64: 2, 8, 32>}, {pipeline_mode = #tpu.pipeline_mode<synchronous>, transform_indices = @transform_2, window_bounds = array<i64: 2, 8, 1>}, {pipeline_mode = #tpu.pipeline_mode<synchronous>, transform_indices = @transform_3, window_bounds = array<i64: 1, 32>}, {pipeline_mode = #tpu.pipeline_mode<synchronous>, transform_indices = @transform_4, window_bounds = array<i64: 8, 32>}, {pipeline_mode = #tpu.pipeline_mode<synchronous>, transform_indices = @transform_5, window_bounds = array<i64: 2, 1>}, {transform_indices = @transform_6, window_bounds = array<i64: 1, 32, 384>}, {transform_indices = @transform_7, window_bounds = array<i64: 1, 128, 32>}, {transform_indices = @transform_8, window_bounds = array<i64: 1, 32, 64>}, {transform_indices = @transform_9, window_bounds = array<i64: 1, 64, 32>}, {transform_indices = @transform_10, window_bounds = array<i64: 1, 1, 384>}, {transform_indices = @transform_11, window_bounds = array<i64: 1, 1, 64>}, {transform_indices = @transform_12, window_bounds = array<i64: 1, 6, 32>}, {pipeline_mode = #tpu.pipeline_mode<synchronous>, transform_indices = @transform_13, window_bounds = array<i64: 2, 8, 32>}]} {
    %c0_i32 = arith.constant 0 : i32
    %0 = arith.cmpi eq, %arg0, %c0_i32 : i32
    %1 = arith.extui %0 : i1 to i32
    %c0_i32_0 = arith.constant 0 : i32
    %2 = arith.cmpi ne, %1, %c0_i32_0 : i32
    scf.if %2 {
      %c0_49 = arith.constant 0 : index
      %c0_50 = arith.constant 0 : index
      %c0_51 = arith.constant 0 : index
      %133 = vector.load %arg1[%c0_49, %c0_50, %c0_51] : memref<2x8x32xf32, #tpu.memory_space<vmem>>, vector<2x8x32xf32>
      %c0_52 = arith.constant 0 : index
      %c0_53 = arith.constant 0 : index
      %c0_54 = arith.constant 0 : index
      %134 = vector.load %arg2[%c0_52, %c0_53, %c0_54] : memref<2x8x32xf32, #tpu.memory_space<vmem>>, vector<2x8x32xf32>
      %135 = arith.addf %133, %134 : vector<2x8x32xf32>
      %c0_55 = arith.constant 0 : index
      %c0_56 = arith.constant 0 : index
      %c0_57 = arith.constant 0 : index
      %136 = vector.load %arg3[%c0_55, %c0_56, %c0_57] : memref<2x8x1xf32, #tpu.memory_space<vmem>>, vector<2x8x1xf32>
      %c0_58 = arith.constant 0 : index
      %c0_59 = arith.constant 0 : index
      %137 = vector.load %arg4[%c0_58, %c0_59] : memref<1x32xf32, #tpu.memory_space<vmem>>, vector<1x32xf32>
      %138 = vector.shape_cast %137 : vector<1x32xf32> to vector<1x1x32xf32>
      %139 = vector.broadcast %136 : vector<2x8x1xf32> to vector<2x8x32xf32>
      %140 = vector.broadcast %138 : vector<1x1x32xf32> to vector<2x8x32xf32>
      %141 = arith.mulf %139, %140 : vector<2x8x32xf32>
      %142 = arith.addf %135, %141 : vector<2x8x32xf32>
      %c0_60 = arith.constant 0 : index
      %c0_61 = arith.constant 0 : index
      %143 = vector.load %arg5[%c0_60, %c0_61] : memref<8x32xf32, #tpu.memory_space<vmem>>, vector<8x32xf32>
      %144 = vector.shape_cast %143 : vector<8x32xf32> to vector<1x8x32xf32>
      %145 = vector.broadcast %144 : vector<1x8x32xf32> to vector<2x8x32xf32>
      %146 = arith.addf %142, %145 : vector<2x8x32xf32>
      %147 = vector.shape_cast %146 : vector<2x8x32xf32> to vector<16x32xf32>
      %c0_62 = arith.constant 0 : index
      %c0_63 = arith.constant 0 : index
      %148 = vector.load %arg15[%c0_62, %c0_63] : memref<16x32xf32, #tpu.memory_space<vmem>>, vector<16x32xf32>
      tpu.vector_store %arg15[%c0_62, %c0_63], %147 {strides = array<i32>} : memref<16x32xf32, #tpu.memory_space<vmem>>, vector<16x32xf32>,
      %c0_64 = arith.constant 0 : index
      %c0_65 = arith.constant 0 : index
      %149 = vector.load %arg6[%c0_64, %c0_65] : memref<2x1xi32, #tpu.memory_space<vmem>>, vector<2x1xi32>
      %150 = tpu.iota {dimensions = array<i32: 2>} : vector<2x4x8xi32>
      %151 = vector.shape_cast %149 : vector<2x1xi32> to vector<2x1x1xi32>
      %152 = vector.broadcast %151 : vector<2x1x1xi32> to vector<2x4x8xi32>
      %153 = arith.cmpi slt, %150, %152 : vector<2x4x8xi32>
      %cst_66 = arith.constant 1.000000e+00 : f32
      %cst_67 = arith.constant 0.000000e+00 : f32
      %154 = vector.broadcast %cst_66 : f32 to vector<2x4x8xf32>
      %155 = vector.broadcast %cst_67 : f32 to vector<2x4x8xf32>
      %156 = arith.select %153, %154, %155 : vector<2x4x8xi1>, vector<2x4x8xf32>
      %157 = vector.shape_cast %156 : vector<2x4x8xf32> to vector<8x8xf32>
      %c0_68 = arith.constant 0 : index
      %c0_69 = arith.constant 0 : index
      %158 = vector.load %arg16[%c0_68, %c0_69] : memref<8x8xf32, #tpu.memory_space<vmem>>, vector<8x8xf32>
      tpu.vector_store %arg16[%c0_68, %c0_69], %157 {strides = array<i32>} : memref<8x8xf32, #tpu.memory_space<vmem>>, vector<8x8xf32>,
    } else {
    }
    %c0 = arith.constant 0 : index
    %c0_1 = arith.constant 0 : index
    %3 = vector.load %arg15[%c0, %c0_1] : memref<16x32xf32, #tpu.memory_space<vmem>>, vector<16x32xf32>
    %4 = arith.truncf %3 : vector<16x32xf32> to vector<16x32xbf16>
    %c0_2 = arith.constant 0 : index
    %c0_3 = arith.constant 0 : index
    %c0_4 = arith.constant 0 : index
    %5 = vector.load %arg7[%c0_2, %c0_3, %c0_4] : memref<1x32x384xbf16, #tpu.memory_space<vmem>>, vector<1x32x384xbf16>
    %6 = vector.shape_cast %5 : vector<1x32x384xbf16> to vector<32x384xbf16>
    %cst = arith.constant dense<0.000000e+00> : vector<16x384xf32>
    %7 = tpu.matmul %4, %6, %cst {dimension_numbers = #tpu.dot_dimension_numbers<[1], [0], [0], [1], [0, 0, 1, 1], [], []>} : vector<16x32xbf16>, vector<32x384xbf16>, vector<16x384xf32> -> vector<16x384xf32>
    %c0_5 = arith.constant 0 : index
    %c0_6 = arith.constant 0 : index
    %c0_7 = arith.constant 0 : index
    %8 = vector.load %arg11[%c0_5, %c0_6, %c0_7] : memref<1x1x384xf32, #tpu.memory_space<vmem>>, vector<1x1x384xf32>
    %9 = vector.shape_cast %8 : vector<1x1x384xf32> to vector<1x384xf32>
    %10 = vector.broadcast %9 : vector<1x384xf32> to vector<16x384xf32>
    %11 = arith.addf %7, %10 : vector<16x384xf32>
    %12 = vector.extract_strided_slice %11 {offsets = [0, 0], sizes = [16, 128], strides = [1, 1]} : vector<16x384xf32> to vector<16x128xf32>
    %cst_8 = arith.constant 0.176776692 : f32
    %13 = vector.broadcast %cst_8 : f32 to vector<16x128xf32>
    %14 = arith.mulf %12, %13 : vector<16x128xf32>
    %15 = vector.extract_strided_slice %11 {offsets = [0, 128], sizes = [16, 128], strides = [1, 1]} : vector<16x384xf32> to vector<16x128xf32>
    %16 = vector.extract_strided_slice %11 {offsets = [0, 256], sizes = [16, 128], strides = [1, 1]} : vector<16x384xf32> to vector<16x128xf32>
    %17 = vector.shape_cast %14 : vector<16x128xf32> to vector<2x8x4x32xf32>
    %18 = tpu.transpose %17, [0, 2, 1, 3] : vector<2x8x4x32xf32> -> vector<2x4x8x32xf32>
    %19 = vector.shape_cast %18 : vector<2x4x8x32xf32> to vector<8x8x32xf32>
    %20 = arith.truncf %19 : vector<8x8x32xf32> to vector<8x8x32xbf16>
    %21 = vector.shape_cast %15 : vector<16x128xf32> to vector<2x8x4x32xf32>
    %22 = tpu.transpose %21, [0, 2, 1, 3] : vector<2x8x4x32xf32> -> vector<2x4x8x32xf32>
    %23 = vector.shape_cast %22 : vector<2x4x8x32xf32> to vector<8x8x32xf32>
    %24 = arith.truncf %23 : vector<8x8x32xf32> to vector<8x8x32xbf16>
    %25 = vector.shape_cast %16 : vector<16x128xf32> to vector<2x8x4x32xf32>
    %26 = tpu.transpose %25, [0, 2, 1, 3] : vector<2x8x4x32xf32> -> vector<2x4x8x32xf32>
    %27 = vector.shape_cast %26 : vector<2x4x8x32xf32> to vector<8x8x32xf32>
    %28 = arith.truncf %27 : vector<8x8x32xf32> to vector<8x8x32xbf16>
    "tpu.trace_start"() <{level = 10 : i32, message = "bqd,bkd->bqk"}> : () -> ()
    %cst_9 = arith.constant dense<0.000000e+00> : vector<8x8x8xf32>
    %29 = tpu.matmul %20, %24, %cst_9 {dimension_numbers = #tpu.dot_dimension_numbers<[2], [2], [1], [1], [0, 0, 0, 1, 1, 1], [0], [0]>} : vector<8x8x32xbf16>, vector<8x8x32xbf16>, vector<8x8x8xf32> -> vector<8x8x8xf32>
    "tpu.trace_stop"() : () -> ()
    %c0_10 = arith.constant 0 : index
    %c0_11 = arith.constant 0 : index
    %30 = vector.load %arg16[%c0_10, %c0_11] : memref<8x8xf32, #tpu.memory_space<vmem>>, vector<8x8xf32>
    %31 = vector.shape_cast %30 : vector<8x8xf32> to vector<8x1x8xf32>
    %cst_12 = arith.constant 0.000000e+00 : f32
    %32 = vector.broadcast %cst_12 : f32 to vector<8x1x8xf32>
    %33 = arith.cmpf one, %31, %32 : vector<8x1x8xf32>
    %cst_13 = arith.constant -1.000000e+06 : f32
    %34 = vector.shape_cast %33 : vector<8x1x8xi1> to vector<8x1x8xi1>
    %35 = vector.broadcast %34 : vector<8x1x8xi1> to vector<8x8x8xi1>
    %36 = vector.broadcast %cst_13 : f32 to vector<8x8x8xf32>
    %37 = arith.select %35, %29, %36 : vector<8x8x8xi1>, vector<8x8x8xf32>
    %cst_14 = arith.constant dense<0xFF800000> : vector<8x8xf32>
    %38 = vector.multi_reduction <maximumf>, %37, %cst_14 [2] : vector<8x8x8xf32> to vector<8x8xf32>
    %39 = vector.shape_cast %38 : vector<8x8xf32> to vector<8x8x1xf32>
    %40 = vector.broadcast %39 : vector<8x8x1xf32> to vector<8x8x8xf32>
    %41 = arith.subf %37, %40 : vector<8x8x8xf32>
    %42 = math.exp %41 : vector<8x8x8xf32>
    %cst_15 = arith.constant dense<0.000000e+00> : vector<8x8xf32>
    %43 = vector.multi_reduction <add>, %42, %cst_15 [2] : vector<8x8x8xf32> to vector<8x8xf32>
    %44 = vector.shape_cast %43 : vector<8x8xf32> to vector<8x8x1xf32>
    %45 = tpu.reciprocal %44 {approx = true} : vector<8x8x1xf32> -> vector<8x8x1xf32>
    %46 = vector.broadcast %45 : vector<8x8x1xf32> to vector<8x8x8xf32>
    %47 = arith.mulf %42, %46 : vector<8x8x8xf32>
    %48 = arith.truncf %47 : vector<8x8x8xf32> to vector<8x8x8xbf16>
    "tpu.trace_start"() <{level = 10 : i32, message = "bqk,bkd->bqd"}> : () -> ()
    %cst_16 = arith.constant dense<0.000000e+00> : vector<8x8x32xf32>
    %49 = tpu.matmul %48, %28, %cst_16 {dimension_numbers = #tpu.dot_dimension_numbers<[2], [1], [1], [2], [0, 0, 0, 1, 1, 2], [0], [0]>} : vector<8x8x8xbf16>, vector<8x8x32xbf16>, vector<8x8x32xf32> -> vector<8x8x32xf32>
    "tpu.trace_stop"() : () -> ()
    %50 = vector.shape_cast %49 : vector<8x8x32xf32> to vector<2x4x8x32xf32>
    %51 = tpu.transpose %50, [0, 2, 1, 3] : vector<2x4x8x32xf32> -> vector<2x8x4x32xf32>
    %52 = vector.shape_cast %51 : vector<2x8x4x32xf32> to vector<16x128xf32>
    %c0_17 = arith.constant 0 : index
    %c0_18 = arith.constant 0 : index
    %c0_19 = arith.constant 0 : index
    %53 = vector.load %arg13[%c0_17, %c0_18, %c0_19] : memref<1x6x32xf32, #tpu.memory_space<vmem>>, vector<1x6x32xf32>
    %54 = vector.shape_cast %53 : vector<1x6x32xf32> to vector<6x32xf32>
    %55 = vector.extract_strided_slice %54 {offsets = [0, 0], sizes = [1, 32], strides = [1, 1]} : vector<6x32xf32> to vector<1x32xf32>
    %56 = vector.extract_strided_slice %54 {offsets = [1, 0], sizes = [1, 32], strides = [1, 1]} : vector<6x32xf32> to vector<1x32xf32>
    %57 = vector.extract_strided_slice %54 {offsets = [2, 0], sizes = [1, 32], strides = [1, 1]} : vector<6x32xf32> to vector<1x32xf32>
    %58 = vector.extract_strided_slice %54 {offsets = [3, 0], sizes = [1, 32], strides = [1, 1]} : vector<6x32xf32> to vector<1x32xf32>
    %59 = vector.extract_strided_slice %54 {offsets = [4, 0], sizes = [1, 32], strides = [1, 1]} : vector<6x32xf32> to vector<1x32xf32>
    %60 = vector.extract_strided_slice %54 {offsets = [5, 0], sizes = [1, 32], strides = [1, 1]} : vector<6x32xf32> to vector<1x32xf32>
    %61 = arith.truncf %52 : vector<16x128xf32> to vector<16x128xbf16>
    %c0_20 = arith.constant 0 : index
    %c0_21 = arith.constant 0 : index
    %c0_22 = arith.constant 0 : index
    %62 = vector.load %arg8[%c0_20, %c0_21, %c0_22] : memref<1x128x32xbf16, #tpu.memory_space<vmem>>, vector<1x128x32xbf16>
    %63 = vector.shape_cast %62 : vector<1x128x32xbf16> to vector<128x32xbf16>
    %cst_23 = arith.constant dense<0.000000e+00> : vector<16x32xf32>
    %64 = tpu.matmul %61, %63, %cst_23 {dimension_numbers = #tpu.dot_dimension_numbers<[1], [0], [0], [1], [0, 0, 1, 1], [], []>} : vector<16x128xbf16>, vector<128x32xbf16>, vector<16x32xf32> -> vector<16x32xf32>
    %65 = vector.broadcast %55 : vector<1x32xf32> to vector<16x32xf32>
    %66 = arith.addf %64, %65 : vector<16x32xf32>
    %67 = arith.addf %66, %3 : vector<16x32xf32>
    %cst_24 = arith.constant dense<0.000000e+00> : vector<16xf32>
    %68 = vector.multi_reduction <add>, %67, %cst_24 [1] : vector<16x32xf32> to vector<16xf32>
    %69 = vector.shape_cast %68 : vector<16xf32> to vector<16x1xf32>
    %cst_25 = arith.constant 3.200000e+01 : f32
    %70 = vector.broadcast %cst_25 : f32 to vector<16x1xf32>
    %71 = arith.divf %69, %70 : vector<16x1xf32>
    %72 = vector.broadcast %71 : vector<16x1xf32> to vector<16x32xf32>
    %73 = arith.subf %67, %72 : vector<16x32xf32>
    %74 = arith.mulf %73, %73 : vector<16x32xf32>
    %cst_26 = arith.constant dense<0.000000e+00> : vector<16xf32>
    %75 = vector.multi_reduction <add>, %74, %cst_26 [1] : vector<16x32xf32> to vector<16xf32>
    %76 = vector.shape_cast %75 : vector<16xf32> to vector<16x1xf32>
    %cst_27 = arith.constant 3.200000e+01 : f32
    %77 = vector.broadcast %cst_27 : f32 to vector<16x1xf32>
    %78 = arith.divf %76, %77 : vector<16x1xf32>
    %79 = vector.broadcast %71 : vector<16x1xf32> to vector<16x32xf32>
    %80 = arith.subf %67, %79 : vector<16x32xf32>
    %cst_28 = arith.constant 9.99999974E-6 : f32
    %81 = vector.broadcast %cst_28 : f32 to vector<16x1xf32>
    %82 = arith.addf %78, %81 : vector<16x1xf32>
    %83 = math.rsqrt %82 : vector<16x1xf32>
    %84 = vector.broadcast %83 : vector<16x1xf32> to vector<16x32xf32>
    %85 = arith.mulf %80, %84 : vector<16x32xf32>
    %86 = vector.broadcast %56 : vector<1x32xf32> to vector<16x32xf32>
    %87 = arith.mulf %85, %86 : vector<16x32xf32>
    %88 = vector.broadcast %57 : vector<1x32xf32> to vector<16x32xf32>
    %89 = arith.addf %87, %88 : vector<16x32xf32>
    %90 = arith.truncf %89 : vector<16x32xf32> to vector<16x32xbf16>
    %c0_29 = arith.constant 0 : index
    %c0_30 = arith.constant 0 : index
    %c0_31 = arith.constant 0 : index
    %91 = vector.load %arg9[%c0_29, %c0_30, %c0_31] : memref<1x32x64xbf16, #tpu.memory_space<vmem>>, vector<1x32x64xbf16>
    %92 = vector.shape_cast %91 : vector<1x32x64xbf16> to vector<32x64xbf16>
    %cst_32 = arith.constant dense<0.000000e+00> : vector<16x64xf32>
    %93 = tpu.matmul %90, %92, %cst_32 {dimension_numbers = #tpu.dot_dimension_numbers<[1], [0], [0], [1], [0, 0, 1, 1], [], []>} : vector<16x32xbf16>, vector<32x64xbf16>, vector<16x64xf32> -> vector<16x64xf32>
    %c0_33 = arith.constant 0 : index
    %c0_34 = arith.constant 0 : index
    %c0_35 = arith.constant 0 : index
    %94 = vector.load %arg12[%c0_33, %c0_34, %c0_35] : memref<1x1x64xf32, #tpu.memory_space<vmem>>, vector<1x1x64xf32>
    %95 = vector.shape_cast %94 : vector<1x1x64xf32> to vector<1x64xf32>
    %96 = vector.broadcast %95 : vector<1x64xf32> to vector<16x64xf32>
    %97 = arith.addf %93, %96 : vector<16x64xf32>
    %cst_36 = arith.constant 0.000000e+00 : f32
    %98 = vector.broadcast %cst_36 : f32 to vector<16x64xf32>
    %99 = arith.maximumf %97, %98 : vector<16x64xf32>
    %100 = arith.truncf %99 : vector<16x64xf32> to vector<16x64xbf16>
    %c0_37 = arith.constant 0 : index
    %c0_38 = arith.constant 0 : index
    %c0_39 = arith.constant 0 : index
    %101 = vector.load %arg10[%c0_37, %c0_38, %c0_39] : memref<1x64x32xbf16, #tpu.memory_space<vmem>>, vector<1x64x32xbf16>
    %102 = vector.shape_cast %101 : vector<1x64x32xbf16> to vector<64x32xbf16>
    %cst_40 = arith.constant dense<0.000000e+00> : vector<16x32xf32>
    %103 = tpu.matmul %100, %102, %cst_40 {dimension_numbers = #tpu.dot_dimension_numbers<[1], [0], [0], [1], [0, 0, 1, 1], [], []>} : vector<16x64xbf16>, vector<64x32xbf16>, vector<16x32xf32> -> vector<16x32xf32>
    %104 = vector.broadcast %58 : vector<1x32xf32> to vector<16x32xf32>
    %105 = arith.addf %103, %104 : vector<16x32xf32>
    %106 = arith.addf %105, %89 : vector<16x32xf32>
    %cst_41 = arith.constant dense<0.000000e+00> : vector<16xf32>
    %107 = vector.multi_reduction <add>, %106, %cst_41 [1] : vector<16x32xf32> to vector<16xf32>
    %108 = vector.shape_cast %107 : vector<16xf32> to vector<16x1xf32>
    %cst_42 = arith.constant 3.200000e+01 : f32
    %109 = vector.broadcast %cst_42 : f32 to vector<16x1xf32>
    %110 = arith.divf %108, %109 : vector<16x1xf32>
    %111 = vector.broadcast %110 : vector<16x1xf32> to vector<16x32xf32>
    %112 = arith.subf %106, %111 : vector<16x32xf32>
    %113 = arith.mulf %112, %112 : vector<16x32xf32>
    %cst_43 = arith.constant dense<0.000000e+00> : vector<16xf32>
    %114 = vector.multi_reduction <add>, %113, %cst_43 [1] : vector<16x32xf32> to vector<16xf32>
    %115 = vector.shape_cast %114 : vector<16xf32> to vector<16x1xf32>
    %cst_44 = arith.constant 3.200000e+01 : f32
    %116 = vector.broadcast %cst_44 : f32 to vector<16x1xf32>
    %117 = arith.divf %115, %116 : vector<16x1xf32>
    %118 = vector.broadcast %110 : vector<16x1xf32> to vector<16x32xf32>
    %119 = arith.subf %106, %118 : vector<16x32xf32>
    %cst_45 = arith.constant 9.99999974E-6 : f32
    %120 = vector.broadcast %cst_45 : f32 to vector<16x1xf32>
    %121 = arith.addf %117, %120 : vector<16x1xf32>
    %122 = math.rsqrt %121 : vector<16x1xf32>
    %123 = vector.broadcast %122 : vector<16x1xf32> to vector<16x32xf32>
    %124 = arith.mulf %119, %123 : vector<16x32xf32>
    %125 = vector.broadcast %59 : vector<1x32xf32> to vector<16x32xf32>
    %126 = arith.mulf %124, %125 : vector<16x32xf32>
    %127 = vector.broadcast %60 : vector<1x32xf32> to vector<16x32xf32>
    %128 = arith.addf %126, %127 : vector<16x32xf32>
    %c0_46 = arith.constant 0 : index
    %c0_47 = arith.constant 0 : index
    %129 = vector.load %arg15[%c0_46, %c0_47] : memref<16x32xf32, #tpu.memory_space<vmem>>, vector<16x32xf32>
    tpu.vector_store %arg15[%c0_46, %c0_47], %128 {strides = array<i32>} : memref<16x32xf32, #tpu.memory_space<vmem>>, vector<16x32xf32>,
    %c1_i32 = arith.constant 1 : i32
    %130 = arith.cmpi eq, %arg0, %c1_i32 : i32
    %131 = arith.extui %130 : i1 to i32
    %c0_i32_48 = arith.constant 0 : i32
    %132 = arith.cmpi ne, %131, %c0_i32_48 : i32
    scf.if %132 {
      %133 = vector.shape_cast %128 : vector<16x32xf32> to vector<2x8x32xf32>
      %c0_49 = arith.constant 0 : index
      %c0_50 = arith.constant 0 : index
      %c0_51 = arith.constant 0 : index
      %134 = vector.load %arg14[%c0_49, %c0_50, %c0_51] : memref<2x8x32xf32, #tpu.memory_space<vmem>>, vector<2x8x32xf32>
      tpu.vector_store %arg14[%c0_49, %c0_50, %c0_51], %133 {strides = array<i32>} : memref<2x8x32xf32, #tpu.memory_space<vmem>>, vector<2x8x32xf32>,
    } else {
    }
    return
  }
  func.func @transform_0(%arg0: i32) -> (i32, i32, i32) {
    %c0_i32 = arith.constant 0 : i32
    %c0_i32_0 = arith.constant 0 : i32
    %c0_i32_1 = arith.constant 0 : i32
    %c0_i32_2 = arith.constant 0 : i32
    return %c0_i32, %c0_i32_0, %c0_i32_1 : i32, i32, i32
  }
  func.func @transform_1(%arg0: i32) -> (i32, i32, i32) {
    %c0_i32 = arith.constant 0 : i32
    %c0_i32_0 = arith.constant 0 : i32
    %c0_i32_1 = arith.constant 0 : i32
    %c0_i32_2 = arith.constant 0 : i32
    return %c0_i32, %c0_i32_0, %c0_i32_1 : i32, i32, i32
  }
  func.func @transform_2(%arg0: i32) -> (i32, i32, i32) {
    %c0_i32 = arith.constant 0 : i32
    %c0_i32_0 = arith.constant 0 : i32
    %c0_i32_1 = arith.constant 0 : i32
    %c0_i32_2 = arith.constant 0 : i32
    return %c0_i32, %c0_i32_0, %c0_i32_1 : i32, i32, i32
  }
  func.func @transform_3(%arg0: i32) -> (i32, i32) {
    %c0_i32 = arith.constant 0 : i32
    %c0_i32_0 = arith.constant 0 : i32
    %c0_i32_1 = arith.constant 0 : i32
    return %c0_i32, %c0_i32_0 : i32, i32
  }
  func.func @transform_4(%arg0: i32) -> (i32, i32) {
    %c0_i32 = arith.constant 0 : i32
    %c0_i32_0 = arith.constant 0 : i32
    %c0_i32_1 = arith.constant 0 : i32
    return %c0_i32, %c0_i32_0 : i32, i32
  }
  func.func @transform_5(%arg0: i32) -> (i32, i32) {
    %c0_i32 = arith.constant 0 : i32
    %c0_i32_0 = arith.constant 0 : i32
    %c0_i32_1 = arith.constant 0 : i32
    return %c0_i32, %c0_i32_0 : i32, i32
  }
  func.func @transform_6(%arg0: i32) -> (i32, i32, i32) {
    %c0_i32 = arith.constant 0 : i32
    %c0_i32_0 = arith.constant 0 : i32
    %c0_i32_1 = arith.constant 0 : i32
    return %arg0, %c0_i32, %c0_i32_0 : i32, i32, i32
  }
  func.func @transform_7(%arg0: i32) -> (i32, i32, i32) {
    %c0_i32 = arith.constant 0 : i32
    %c0_i32_0 = arith.constant 0 : i32
    %c0_i32_1 = arith.constant 0 : i32
    return %arg0, %c0_i32, %c0_i32_0 : i32, i32, i32
  }
  func.func @transform_8(%arg0: i32) -> (i32, i32, i32) {
    %c0_i32 = arith.constant 0 : i32
    %c0_i32_0 = arith.constant 0 : i32
    %c0_i32_1 = arith.constant 0 : i32
    return %arg0, %c0_i32, %c0_i32_0 : i32, i32, i32
  }
  func.func @transform_9(%arg0: i32) -> (i32, i32, i32) {
    %c0_i32 = arith.constant 0 : i32
    %c0_i32_0 = arith.constant 0 : i32
    %c0_i32_1 = arith.constant 0 : i32
    return %arg0, %c0_i32, %c0_i32_0 : i32, i32, i32
  }
  func.func @transform_10(%arg0: i32) -> (i32, i32, i32) {
    %c0_i32 = arith.constant 0 : i32
    %c0_i32_0 = arith.constant 0 : i32
    %c0_i32_1 = arith.constant 0 : i32
    return %arg0, %c0_i32, %c0_i32_0 : i32, i32, i32
  }
  func.func @transform_11(%arg0: i32) -> (i32, i32, i32) {
    %c0_i32 = arith.constant 0 : i32
    %c0_i32_0 = arith.constant 0 : i32
    %c0_i32_1 = arith.constant 0 : i32
    return %arg0, %c0_i32, %c0_i32_0 : i32, i32, i32
  }
  func.func @transform_12(%arg0: i32) -> (i32, i32, i32) {
    %c0_i32 = arith.constant 0 : i32
    %c0_i32_0 = arith.constant 0 : i32
    %c0_i32_1 = arith.constant 0 : i32
    return %arg0, %c0_i32, %c0_i32_0 : i32, i32, i32
  }
  func.func @transform_13(%arg0: i32) -> (i32, i32, i32) {
    %c0_i32 = arith.constant 0 : i32
    %c0_i32_0 = arith.constant 0 : i32
    %c0_i32_1 = arith.constant 0 : i32
    %c0_i32_2 = arith.constant 0 : i32
    return %c0_i32, %c0_i32_0, %c0_i32_1 : i32, i32, i32
  }
}

</mosaic_0001>

<bundles_post_ra>
// kernel: tpu_custom_call.1
= control target key start
LH: loop header
LB: loop body
LE: loop exit
PB: predicated region body
PF: predicated region fallthrough
CT: control target
= control target key end

     0   :  { %s4524_s0 = inlined_call_operand.vmem [shape: f32[2,8,32], index: 0, kind: input, shape index: {}]   ;;  %s4525_s1 = inlined_call_operand.vmem [shape: f32[2,8,32], index: 1, kind: input, shape index: {}]   ;;  %s4526_s2 = inlined_call_operand.vmem [shape: f32[2,8,1], index: 2, kind: input, shape index: {}]   ;;  %s4527_s3 = inlined_call_operand.vmem [shape: f32[1,32], index: 3, kind: input, shape index: {}]   ;;  %s4528_s4 = inlined_call_operand.vmem [shape: f32[8,32], index: 4, kind: input, shape index: {}]   ;;  %s4529_s5 = inlined_call_operand.vmem [shape: s32[2,1], index: 5, kind: input, shape index: {}]   ;;  %s4530_s6 = inlined_call_operand.vmem [shape: bf16[2,32,384], index: 6, kind: input, shape index: {}]   ;;  %s4531_s7 = inlined_call_operand.vmem [shape: bf16[2,128,32], index: 7, kind: input, shape index: {}]   ;;  %s4532_s8 = inlined_call_operand.vmem [shape: bf16[2,32,64], index: 8, kind: input, shape index: {}]   ;;  %s4533_s9 = inlined_call_operand.vmem [shape: bf16[2,64,32], index: 9, kind: input, shape index: {}]   ;;  %s4534_s10 = inlined_call_operand.vmem [shape: f32[2,1,384], index: 10, kind: input, shape index: {}]   ;;  %s4535_s11 = inlined_call_operand.vmem [shape: f32[2,1,64], index: 11, kind: input, shape index: {}]   ;;  %s4536_s12 = inlined_call_operand.vmem [shape: f32[2,6,32], index: 12, kind: input, shape index: {}]   ;;  %s4537_s13 = inlined_call_operand.hbm [shape: f32[2,8,32], index: 13, kind: output, shape index: {}]  }
   0x1   :  { %4539 = sst [smem:[#allocation8_spill]] %s4528_s4 }
   0x2   :  { %4540 = sst [smem:[#allocation9_spill]] %s4531_s7 }
   0x3   :  { %4541 = sst [smem:[#allocation10_spill]] %s4537_s13 }
   0x4   :  { %18 = vsyncpa [#allocation5], 0  ;;  %s3913_s25 = smov 0  }
   0x5 LB: > { %4542 = sst [smem:[#allocation7_spill]] %s3826_s25  ;;  %s3919_s26 = sadd.s32 4294967295, %s3826_s25   ;;  %s3826_s25 = sphi %s3913_s25, %s24_s25  }
   0x6   : > { %p3406_p0 = scmp.ge.s32.totalorder %s3826_s25, 1  ;;  %p439_p1 = scmp.lt.s32.totalorder %s3826_s25, 3 }
   0x8   : > { %p440_p2 = pnand %p3406_p0, %p439_p1 }
   0x9   : > { %p504_p3 = scmp.lt.s32.totalorder (!%p440_p2), %s3919_s26, 1  ;;  %s4543_s7 = sld [smem:[#allocation9_spill]] (!%p440_p2) }
   0xa   : > { %443 = sbr.rel (%p440_p2) target bundleno = 2740 (0xab4), region = 72  ;;  %p3415_p4 = scmp.ne.s32.totalorder (!%p440_p2), %s3919_s26, 0 }
   0xf   : > { %s3925_s27 = scalar_select %p504_p3, %s3919_s26, 1 }
  0x10   : > { %s4544_s17 = sld [smem:[#allocation8_spill]] (!%p3415_p4) }
  0x11   : > { %s3679_s28 = smul.u32 48, %s3925_s27  ;;  %s3480_s29 = sshll.u32 %s3925_s27, 6 }
  0x12   : > { %s3932_s15 = scalar_lea.vmem %s4543_s7, %s3480_s29  ;;  %s3481_s16 = sshll.u32 %s3925_s27, 4 }
  0x13   : > { %s3938_s19 = scalar_lea.vmem %s4530_s6, %s3679_s28  ;;  %s3943_s22 = scalar_lea.vmem %s4532_s8, %s3481_s16 }
  0x14   : > { %s3482_s23 = sshll.u32 %s3925_s27, 5  ;;  %s3680_s24 = smul.u32 3, %s3925_s27 }
  0x15   : > { %s3950_s4 = scalar_lea.vmem %s4533_s9, %s3482_s23  ;;  %s530_s14 = scalar_lea.vmem %s4535_s11, %s3925_s27 }
  0x16   : > { %s3959_s28 = scalar_lea.vmem %s4534_s10, %s3680_s24  ;;  %s3414_s18 = sshll.u32 %s3925_s27, 3 }
  0x17   : > { %s3965_s21 = scalar_lea.vmem %s4536_s12, %s3414_s18  ;;  %539 = sbr.rel (%p3415_p4) target bundleno = 172 (0xac), region = 76 }
  0x1c   : > { %v546_v0 = vld [vmem:[%s4526_s2] sm:$0xff]  ;;  %v576_v1 = vlaneseq  ;;  %v3828_v2 = vmov 0   ;;  %v3829_v3 = vmov 1966171168   ;;  %v547_v7 = vld [vmem:[%s4526_s2 + $0x8] sm:$0xff]  ;;  %vm572_vm0 = vcmask 261120  }
  0x1d   : > { %3710 = vset.pattern.permute.xlu0 %v3828_v2  ;;  %3711 = vset.pattern.permute.xlu1 %v3828_v2  ;;  %v587_v4 = vunpack.c.l.s4 %v3829_v3  ;;  %v3417_v5 = vld.sshfl [vmem:[%s4529_s5] sm:$0x11 pattern:$0x75316420]  ;;  %v541_v21 = vld [vmem:[%s4524_s0 + $0x8] sm:$0xff]  ;;  %v3830_v35 = vmov 0.0  }
  0x1e   : > { %551 = vperm.xlu0 %3710, %v546_v0   ;;  %v590_v6 = vshrl.u32 %v576_v1, 7  ;;  %v585_v8 = vcombine.high %v3417_v5, %v3417_v5  ;;  %v540_v16 = vld [vmem:[%s4524_s0] sm:$0xff]  ;;  %v543_v22 = vld [vmem:[%s4525_s1 + $0x8] sm:$0xff]  ;;  %v577_v31 = vand.u32 127, %v576_v1  ;;  %vm622_vm3 = vcmask 64512  }
  0x1f   : > { %v588_v9 = vunpack.c.0.s8 %v587_v4  ;;  %v542_v17 = vld [vmem:[%s4525_s1] sm:$0xff]  ;;  %v545_v26 = vadd.f32 %v543_v22, %v541_v21 }
  0x20   : > { %v602_v11 = vsub.s32 0, %v590_v6  ;;  %v3416_v18 = vld [vmem:[%s4527_s3] ss:$0 sm:$0xff]  ;;  %v544_v19 = vadd.f32 %v542_v17, %v540_v16 }
  0x21   : > { %v591_v10 = vsub.s32 %v588_v9, %v590_v6  ;;  %v569_v24 = vld [vmem:[%s4544_s17] sm:$0xff] }
  0x22   : > { %556 = vperm.xlu0 %3710, %v547_v7  }
  0x23   : > { %v592_v12 = vrot.slane %v3417_v5, %v591_v10  ;;  %v599_v13 = vrot.slane %v585_v8, %v591_v10 }
  0x25   : > { %v603_v14 = vrot.slane %v592_v12, %v602_v11  ;;  %v607_v15 = vrot.slane %v599_v13, %v602_v11 }
  0x27   : > { %609 = vperm.xlu1 %3711, %v603_v14  }
  0x2b   : > { %612 = vperm.xlu1 %3711, %v607_v15  }
  0x99   : > { %v552_v20 = vpop.permute.xlu0 %551 }
  0x9a   : > { %v565_v23 = vmul.f32 %v3416_v18, %v552_v20 }
  0x9c   : > { %v567_v25 = vadd.f32 %v565_v23, %v544_v19 }
  0x9d   : > { %v557_v27 = vpop.permute.xlu0 %556 }
  0x9e   : > { %v570_v28 = vadd.f32 %v569_v24, %v567_v25  ;;  %v566_v29 = vmul.f32 %v3416_v18, %v557_v27 }
  0xa0   : > { %573 = vst.msk [vmem:[#allocation2] sm:$0xff] %vm572_vm0, %v570_v28  ;;  %v568_v30 = vadd.f32 %v566_v29, %v545_v26 }
  0xa2   : > { %v571_v32 = vadd.f32 %v569_v24, %v568_v30  ;;  %v610_v33 = vpop.permute.xlu1 %609 }
  0xa3   : > { %vm614_vm1 = vcmp.lt.s32.totalorder %v577_v31, %v610_v33 }
  0xa4   : > { %574 = vst.msk [vmem:[#allocation2 + $0x8] sm:$0xff] %vm572_vm0, %v571_v32  ;;  %v616_v36 = vsel %vm614_vm1, 1.0, %v3830_v35 }
  0xa6   : > { %v613_v34 = vpop.permute.xlu1 %612 }
  0xa7   : > { %vm615_vm2 = vcmp.lt.s32.totalorder %v577_v31, %v613_v34 }
  0xa8   : > { %v617_v37 = vsel %vm615_vm2, 1.0, %v3830_v35 }
  0xa9   : > { %v620_v38 = vcombine.low %v616_v36, %v617_v37 }
  0xab   : > { %623 = vst.msk [vmem:[#allocation3] sm:$0xff] %vm622_vm3, %v620_v38 }
  0xac PF: > { %v3727_v39 = vld [vmem:[%s3938_s19 + $0x1c] ss:$12 sps:$4 sm:$0xff]   ;;  %v3729_v40 = vld [vmem:[%s3938_s19 + $0x18] ss:$12 sps:$4 sm:$0xff]   ;;  %v3831_v41 = vmov 0   ;;  %vm684_vm4 = vcmask 261120   ;;  %v637_v50 = vlaneseq }
  0xad   : > { %720 = vmatprep.mubr.bf16.mxu0 %v3831_v41  ;;  %700 = vmatprep.subr.bf16.mxu0 %v3727_v39  ;;  %v3730_v42 = vld [vmem:[%s3938_s19 + $0x4] ss:$12 sps:$4 sm:$0xff]   ;;  %v3732_v43 = vld [vmem:[%s3938_s19] ss:$12 sps:$4 sm:$0xff]   ;;  %v3832_v48 = vmov 0.0   ;;  %vm3833_vm5 = vmmov 0  }
  0xae   : > { %701 = vmatpush1.bf16.msra.mxu0 %v3729_v40  ;;  %v624_v44 = vld [vmem:[#allocation2] sm:$0xff]  ;;  %v625_v45 = vld [vmem:[#allocation2 + $0x8] sm:$0xff]  ;;  %3535 = vmatprep.subr.bf16.mxu1 %v3832_v48  ;;  %v4014_v51 = vshrl.u32 %v637_v50, 7  ;;  %s3835_s18 = smov 96   ;;  %s3836_s20 = smov 64   ;;  %vm2165_vm12 = vcmask 64512  }
  0xaf   : > { %702 = vmatprep.subr.bf16.mxu0 %v3730_v42  ;;  %v626_v46 = vpack.c.bf16 %v625_v45, %v624_v44  ;;  %v3733_v47 = vld [vmem:[%s3938_s19 + $0x20] ss:$12 sps:$4 sm:$0xff]   ;;  %3539 = vmatprep.mubr.msk.bf16.mxu1 %vm3833_vm5, %v3832_v48  ;;  %v3734_v49 = vld [vmem:[%s3938_s19 + $0x8] ss:$12 sps:$4 sm:$0xff]   ;;  %s3834_s19 = smov 32   ;;  %p3475_p5 = scmp.ne.s32.totalorder %s3919_s26, 1 }
  0xb0   : > { %3536 = vmatpush3.bf16.msra.mxu1 %v3733_v47  ;;  %v4017_v52 = vsub.s32 0, %v4014_v51  ;;  %v643_v53 = vsub.s32 1, %v4014_v51  ;;  %v635_v54 = vld [vmem:[%s3959_s28] sm:$0x7]  ;;  %v647_v3 = vsub.s32 2, %v4014_v51 }
  0xb1   : > { %3537 = vmatprep.subr.bf16.mxu1 %v3832_v48  ;;  %v3837_v11 = vmov 1983009808   ;;  %v3838_v13 = vmov 1934713408  }
  0xb2   : > { %703 = vmatpush1.bf16.msra.mxu0 %v3732_v43  ;;  %v640_v55 = vrot.slane %v635_v54, %v4017_v52  ;;  %v644_v56 = vrot.slane %v635_v54, %v643_v53  ;;  %v648_v4 = vrot.slane %v635_v54, %v647_v3  ;;  %v797_v12 = vunpack.c.l.s4 %v3837_v11 }
  0xb3   : > { %3543 = vmatprep.subr.bf16.mxu0 %v3832_v48  ;;  %v829_v14 = vunpack.c.l.s4 %v3838_v13 }
  0xb4   : > { %3538 = vmatpush3.bf16.msra.mxu1 %v3734_v49  ;;  %v798_v15 = vunpack.c.0.s8 %v797_v12 }
  0xb5   : > { %3424 = vmatmul.mubr.msk.bf16.vlgmr.msra.gmra.mxu0 %vm684_vm4, %v626_v46  ;;  %3549 = vmatprep.subr.bf16.mxu1 %v3832_v48  ;;  %v830_v18 = vunpack.c.0.s8 %v829_v14 }
  0xb6   : > { %3545 = vmatprep.mubr.msk.bf16.mxu0 %vm3833_vm5, %v3832_v48  ;;  %v4056_v19 = vsub.s32 %v798_v15, %v4014_v51 }
  0xb7   : > { %3540 = vmatmul.mubr.msk.bf16.vlgmr.msra.gmra.mxu1 %vm684_vm4, %v626_v46  ;;  %v4059_v26 = vsub.s32 %v830_v18, %v4014_v51 }
  0xb8   : > { %3551 = vmatprep.mubr.msk.bf16.mxu1 %vm3833_vm5, %v3832_v48 }
 0x175   : > { %v722_v57 = vpop.f32.mrf.mxu0 }
 0x176   : > { %v723_v59 = vadd.f32 %v722_v57, %v640_v55 }
 0x177   : > { %v724_v58 = vpop.f32.mrf.mxu0  ;;  %v765_v5 = vpop.f32.mrf.mxu1 }
 0x178   : > { %v725_v60 = vadd.f32 %v724_v58, %v644_v56  ;;  %v772_v61 = vmul.f32 0.17677669, %v723_v59  ;;  %v4049_v6 = vadd.f32 %v765_v5, %v648_v4 }
 0x179   : > { %v726_v62 = vpop.f32.mrf.mxu0  ;;  %v3541_v7 = vpop.f32.mrf.mxu1 }
 0x17a   : > { %1088 = vrot.lane.b32.xlu1 %v725_v60, %s3834_s19  ;;  %1076 = vrot.lane.b32.xlu0 %v725_v60, %s3835_s18  ;;  %v727_v0 = vadd.f32 %v726_v62, %v640_v55 }
 0x17b   : > { %v728_v63 = vpop.f32.mrf.mxu0  ;;  %v768_v8 = vpop.f32.mrf.mxu1 }
 0x17c   : > { %v4030_v1 = vadd.f32 %v728_v63, %v644_v56  ;;  %v4036_v2 = vmul.f32 0.17677669, %v727_v0  ;;  %v4053_v9 = vadd.f32 %v768_v8, %v648_v4 }
 0x17d   : > { %v3542_v10 = vpop.f32.mrf.mxu1 }
 0x17e   : > { %1082 = vrot.lane.b32.xlu0 %v725_v60, %s3836_s20  ;;  %776 = vrot.lane.b32.xlu1 %v772_v61, %s3835_s18 }
 0x182   : > { %782 = vrot.lane.b32.xlu0 %v772_v61, %s3836_s20  ;;  %788 = vrot.lane.b32.xlu1 %v772_v61, %s3834_s19 }
 0x186   : > { %1078 = vrot.lane.b32.xlu0 %v4030_v1, %s3835_s18  ;;  %1084 = vrot.lane.b32.xlu1 %v4030_v1, %s3836_s20 }
 0x18a   : > { %1090 = vrot.lane.b32.xlu0 %v4030_v1, %s3834_s19  ;;  %778 = vrot.lane.b32.xlu1 %v4036_v2, %s3835_s18 }
 0x18e   : > { %784 = vrot.lane.b32.xlu0 %v4036_v2, %s3836_s20  ;;  %790 = vrot.lane.b32.xlu1 %v4036_v2, %s3834_s19 }
 0x192   : > { %1376 = vrot.lane.b32.xlu1 %v4049_v6, %s3835_s18 }
 0x1ec   : > { %v1089_v16 = vpop.permute.xlu1 %1088  ;;  %v1077_v17 = vpop.permute.xlu0 %1076 }
 0x1ed   : > { %v1110_v20 = vcombine.low %v1077_v17, %v1089_v16  ;;  %v1111_v21 = vcombine.high %v1077_v17, %v1089_v16 }
 0x1ef   : > { %v1118_v27 = vrot.slane %v1110_v20, %v4056_v19  ;;  %v1125_v28 = vrot.slane %v1111_v21, %v4056_v19 }
 0x1f0   : > { %v1083_v22 = vpop.permute.xlu0 %1082  ;;  %v777_v23 = vpop.permute.xlu1 %776 }
 0x1f1   : > { %v1094_v24 = vcombine.low %v725_v60, %v1083_v22  ;;  %v1095_v25 = vcombine.high %v725_v60, %v1083_v22 }
 0x1f3   : > { %v1102_v29 = vrot.slane %v1094_v24, %v4056_v19  ;;  %v1109_v30 = vrot.slane %v1095_v25, %v4056_v19 }
 0x1f4   : > { %v783_v31 = vpop.permute.xlu0 %782  ;;  %v789_v32 = vpop.permute.xlu1 %788 }
 0x1f5   : > { %v1126_v33 = vcombine.low %v1102_v29, %v1118_v27  ;;  %v1127_v34 = vcombine.high %v1102_v29, %v1118_v27  ;;  %v1142_v35 = vcombine.low %v1109_v30, %v1125_v28  ;;  %v1143_v36 = vcombine.high %v1109_v30, %v1125_v28 }
 0x1f6   : > { %v794_v37 = vcombine.low %v772_v61, %v783_v31  ;;  %v795_v38 = vcombine.high %v772_v61, %v783_v31  ;;  %v810_v39 = vcombine.low %v777_v23, %v789_v32  ;;  %v811_v40 = vcombine.high %v777_v23, %v789_v32 }
 0x1f7   : > { %v1134_v42 = vrot.slane %v1126_v33, %v4059_v26  ;;  %v1141_v43 = vrot.slane %v1127_v34, %v4059_v26  ;;  %v1150_v44 = vrot.slane %v1142_v35, %v4059_v26  ;;  %v1157_v45 = vrot.slane %v1143_v36, %v4059_v26 }
 0x1f8   : > { %v802_v46 = vrot.slane %v794_v37, %v4056_v19  ;;  %v809_v47 = vrot.slane %v795_v38, %v4056_v19  ;;  %v818_v49 = vrot.slane %v810_v39, %v4056_v19  ;;  %v825_v50 = vrot.slane %v811_v40, %v4056_v19  ;;  %v1079_v54 = vpop.permute.xlu0 %1078  ;;  %v1085_v55 = vpop.permute.xlu1 %1084 }
 0x1f9   : > { %v1230_v60 = vcombine.low %v1134_v42, %v1141_v43  ;;  %v3430_v61 = vcombine.high %v1134_v42, %v1141_v43  ;;  %v1246_v62 = vcombine.low %v1150_v44, %v1157_v45  ;;  %v3431_v63 = vcombine.high %v1150_v44, %v1157_v45 }
 0x1fa   : > { %v826_v56 = vcombine.low %v802_v46, %v818_v49  ;;  %v827_v57 = vcombine.high %v802_v46, %v818_v49  ;;  %v842_v58 = vcombine.low %v809_v47, %v825_v50  ;;  %v843_v59 = vcombine.high %v809_v47, %v825_v50 }
 0x1fb   : > { %v1162_v11 = vcombine.low %v4030_v1, %v1085_v55  ;;  %v1163_v12 = vcombine.high %v4030_v1, %v1085_v55  ;;  %v1237_v30 = vrot.slane %v1230_v60, %v4056_v19  ;;  %v1245_v31 = vrot.slane %v3430_v61, %v4056_v19 }
 0x1fc   : > { %v834_v0 = vrot.slane %v826_v56, %v4059_v26  ;;  %v841_v4 = vrot.slane %v827_v57, %v4059_v26  ;;  %v850_v5 = vrot.slane %v842_v58, %v4059_v26  ;;  %v857_v7 = vrot.slane %v843_v59, %v4059_v26  ;;  %v1091_v8 = vpop.permute.xlu0 %1090  ;;  %v779_v10 = vpop.permute.xlu1 %778 }
 0x1fd   : > { %v1178_v13 = vcombine.low %v1079_v54, %v1091_v8  ;;  %v1179_v14 = vcombine.high %v1079_v54, %v1091_v8  ;;  %v1170_v20 = vrot.slane %v1162_v11, %v4056_v19  ;;  %v1177_v21 = vrot.slane %v1163_v12, %v4056_v19 }
 0x1fe   : > { %v930_v15 = vcombine.low %v834_v0, %v841_v4  ;;  %v3426_v16 = vcombine.high %v834_v0, %v841_v4  ;;  %v946_v17 = vcombine.low %v850_v5, %v857_v7  ;;  %v3427_v18 = vcombine.high %v850_v5, %v857_v7 }
 0x1ff   : > { %v1186_v22 = vrot.slane %v1178_v13, %v4056_v19  ;;  %v1193_v23 = vrot.slane %v1179_v14, %v4056_v19  ;;  %v1253_v32 = vrot.slane %v1246_v62, %v4056_v19  ;;  %v1261_v33 = vrot.slane %v3431_v63, %v4056_v19 }
 0x200   : > { %v785_v29 = vpop.permute.xlu0 %784  ;;  %v791_v1 = vpop.permute.xlu1 %790  ;;  %v4088_v34 = vrot.slane %v930_v15, %v4056_v19  ;;  %v4091_v35 = vrot.slane %v3426_v16, %v4056_v19  ;;  %v4094_v36 = vrot.slane %v946_v17, %v4056_v19  ;;  %v4097_v37 = vrot.slane %v3427_v18, %v4056_v19 }
 0x201   : > { %v1194_v24 = vcombine.low %v1170_v20, %v1186_v22  ;;  %v1195_v25 = vcombine.high %v1170_v20, %v1186_v22  ;;  %v1210_v27 = vcombine.low %v1177_v21, %v1193_v23  ;;  %v1211_v28 = vcombine.high %v1177_v21, %v1193_v23 }
 0x202   : > { %v862_v38 = vcombine.low %v4036_v2, %v785_v29  ;;  %v863_v39 = vcombine.high %v4036_v2, %v785_v29  ;;  %v878_v40 = vcombine.low %v779_v10, %v791_v1  ;;  %v879_v42 = vcombine.high %v779_v10, %v791_v1 }
 0x203   : > { %v1202_v43 = vrot.slane %v1194_v24, %v4059_v26  ;;  %v1209_v44 = vrot.slane %v1195_v25, %v4059_v26  ;;  %v1218_v45 = vrot.slane %v1210_v27, %v4059_v26  ;;  %v1225_v46 = vrot.slane %v1211_v28, %v4059_v26 }
 0x204   : > { %v870_v47 = vrot.slane %v862_v38, %v4056_v19  ;;  %v877_v49 = vrot.slane %v863_v39, %v4056_v19  ;;  %v886_v50 = vrot.slane %v878_v40, %v4056_v19  ;;  %v893_v54 = vrot.slane %v879_v42, %v4056_v19 }
 0x205   : > { %v962_v2 = vcombine.low %v4088_v34, %v4091_v35  ;;  %v978_v55 = vcombine.low %v4094_v36, %v4097_v37  ;;  %v1298_v58 = vcombine.low %v1202_v43, %v1209_v44  ;;  %v3432_v59 = vcombine.high %v1202_v43, %v1209_v44 }
 0x206   : > { %v894_v56 = vcombine.low %v870_v47, %v886_v50  ;;  %v895_v57 = vcombine.high %v870_v47, %v886_v50  ;;  %v1262_v60 = vcombine.low %v1237_v30, %v1245_v31  ;;  %v1278_v61 = vcombine.low %v1253_v32, %v1261_v33 }
 0x207   : > { %v1314_v62 = vcombine.low %v1218_v45, %v1225_v46  ;;  %v3433_v63 = vcombine.high %v1218_v45, %v1225_v46  ;;  %v910_v0 = vcombine.low %v877_v49, %v893_v54  ;;  %v911_v4 = vcombine.high %v877_v49, %v893_v54 }
 0x208   : > { %v963_v5 = vcombine.high %v4088_v34, %v4091_v35  ;;  %v979_v7 = vcombine.high %v4094_v36, %v4097_v37  ;;  %v1270_v8 = vrot.slane %v1262_v60, %v4059_v26  ;;  %v1286_v10 = vrot.slane %v1278_v61, %v4059_v26 }
 0x209   : > { %v902_v11 = vrot.slane %v894_v56, %v4059_v26  ;;  %v909_v12 = vrot.slane %v895_v57, %v4059_v26  ;;  %v970_v13 = vrot.slane %v962_v2, %v4059_v26  ;;  %v986_v14 = vrot.slane %v978_v55, %v4059_v26 }
 0x20a   : > { %v4124_v15 = vrot.slane %v1298_v58, %v4056_v19  ;;  %v1313_v16 = vrot.slane %v3432_v59, %v4056_v19  ;;  %v1294_v17 = vcombine.low %v1270_v8, %v1286_v10  ;;  %v1295_v18 = vcombine.high %v1270_v8, %v1286_v10 }
 0x20b   : > { %v1321_v20 = vrot.slane %v1314_v62, %v4056_v19  ;;  %v1329_v21 = vrot.slane %v3433_v63, %v4056_v19  ;;  %v918_v22 = vrot.slane %v910_v0, %v4059_v26  ;;  %v925_v23 = vrot.slane %v911_v4, %v4059_v26 }
 0x20c   : > { %v1366_v24 = vpack.c.bf16 %v1294_v17, %v1294_v17  ;;  %v1367_v25 = vpack.c.bf16 %v1295_v18, %v1295_v18  ;;  %v1263_v27 = vcombine.high %v1237_v30, %v1245_v31  ;;  %v1279_v28 = vcombine.high %v1253_v32, %v1261_v33 }
 0x20d   : > { %v998_v29 = vcombine.low %v902_v11, %v909_v12  ;;  %v3428_v1 = vcombine.high %v902_v11, %v909_v12  ;;  %v994_v34 = vcombine.low %v970_v13, %v986_v14  ;;  %v995_v35 = vcombine.high %v970_v13, %v986_v14 }
 0x20e   : > { %v1678_v36 = vsel %vm684_vm4, %v1366_v24, 0  ;;  %v1724_v37 = vsel %vm684_vm4, %v1367_v25, 0  ;;  %v1277_v38 = vrot.slane %v1263_v27, %v4059_v26  ;;  %v1293_v39 = vrot.slane %v1279_v28, %v4059_v26 }
 0x20f   : > { %v1014_v40 = vcombine.low %v918_v22, %v925_v23  ;;  %v3429_v42 = vcombine.high %v918_v22, %v925_v23  ;;  %3544 = vmatpush3.bf16.xpose.msra.mxu0 %v1678_v36  ;;  %3550 = vmatpush3.bf16.xpose.msra.mxu1 %v1724_v37  ;;  %v1330_v43 = vcombine.low %v4124_v15, %v1313_v16 }
 0x210   : > { %3555 = vmatprep.subr.bf16.mxu0 %v3832_v48  ;;  %3561 = vmatprep.subr.bf16.mxu1 %v3832_v48  ;;  %v1296_v30 = vcombine.low %v1277_v38, %v1293_v39  ;;  %v1297_v31 = vcombine.high %v1277_v38, %v1293_v39  ;;  %v1346_v32 = vcombine.low %v1321_v20, %v1329_v21 }
 0x211   : > { %v1338_v45 = vrot.slane %v1330_v43, %v4059_v26  ;;  %v1005_v47 = vrot.slane %v998_v29, %v4056_v19  ;;  %v1013_v49 = vrot.slane %v3428_v1, %v4056_v19  ;;  %v1066_v50 = vpack.c.bf16 %v994_v34, %v994_v34 }
 0x212   : > { %v1368_v33 = vpack.c.bf16 %v1296_v30, %v1296_v30  ;;  %v1369_v44 = vpack.c.bf16 %v1297_v31, %v1297_v31  ;;  %v1354_v46 = vrot.slane %v1346_v32, %v4059_v26  ;;  %v1067_v54 = vpack.c.bf16 %v995_v35, %v995_v35 }
 0x213   : > { %v1021_v2 = vrot.slane %v1014_v40, %v4056_v19  ;;  %v1029_v55 = vrot.slane %v3429_v42, %v4056_v19  ;;  %v977_v56 = vrot.slane %v963_v5, %v4059_v26  ;;  %v993_v57 = vrot.slane %v979_v7, %v4059_v26 }
 0x214   : > { %v1331_v58 = vcombine.high %v4124_v15, %v1313_v16  ;;  %v1347_v59 = vcombine.high %v1321_v20, %v1329_v21  ;;  %v1770_v60 = vsel %vm684_vm4, %v1368_v33, 0  ;;  %v1816_v61 = vsel %vm684_vm4, %v1369_v44, 0  ;;  %v2042_v33 = vld [vmem:[#allocation3] sm:$0xff] }
 0x215   : > { %v1362_v62 = vcombine.low %v1338_v45, %v1354_v46  ;;  %v1363_v63 = vcombine.high %v1338_v45, %v1354_v46  ;;  %v1030_v0 = vcombine.low %v1005_v47, %v1013_v49  ;;  %v1046_v4 = vcombine.low %v1021_v2, %v1029_v55 }
 0x216   : > { %3546 = vmatmul.mubr.msk.bf16.vlgmr.msra.gmra.mxu0 %vm684_vm4, %v1066_v50  ;;  %3552 = vmatmul.mubr.msk.bf16.vlgmr.msra.gmra.mxu1 %vm684_vm4, %v1067_v54  ;;  %v996_v5 = vcombine.low %v977_v56, %v993_v57  ;;  %v997_v7 = vcombine.high %v977_v56, %v993_v57  ;;  %v1345_v11 = vrot.slane %v1331_v58, %v4059_v26  ;;  %v3839_v43 = vmov 1966171168  }
 0x217   : > { %3556 = vmatpush3.bf16.xpose.msra.mxu0 %v1770_v60  ;;  %3562 = vmatpush3.bf16.xpose.msra.mxu1 %v1816_v61  ;;  %v1370_v8 = vpack.c.bf16 %v1362_v62, %v1362_v62  ;;  %v1371_v10 = vpack.c.bf16 %v1363_v63, %v1363_v63  ;;  %v1361_v12 = vrot.slane %v1347_v59, %v4059_v26  ;;  %v2046_v30 = vunpack.c.l.s4 %v3839_v43 }
 0x218   : > { %3557 = vmatprep.mubr.msk.bf16.mxu0 %vm3833_vm5, %v3832_v48  ;;  %3563 = vmatprep.mubr.msk.bf16.mxu1 %vm3833_vm5, %v3832_v48  ;;  %v1068_v13 = vpack.c.bf16 %v996_v5, %v996_v5  ;;  %v1069_v14 = vpack.c.bf16 %v997_v7, %v997_v7  ;;  %v1038_v15 = vrot.slane %v1030_v0, %v4059_v26 }
 0x219   : > { %3567 = vmatprep.subr.bf16.mxu0 %v3832_v48  ;;  %3573 = vmatprep.subr.bf16.mxu1 %v3832_v48  ;;  %v1054_v16 = vrot.slane %v1046_v4, %v4059_v26  ;;  %v1862_v17 = vsel %vm684_vm4, %v1370_v8, 0  ;;  %v1908_v18 = vsel %vm684_vm4, %v1371_v10, 0  ;;  %v1364_v20 = vcombine.low %v1345_v11, %v1361_v12 }
 0x21a   : > { %v1365_v21 = vcombine.high %v1345_v11, %v1361_v12  ;;  %v1031_v22 = vcombine.high %v1005_v47, %v1013_v49  ;;  %v1047_v23 = vcombine.high %v1021_v2, %v1029_v55  ;;  %v2047_v31 = vunpack.c.0.s8 %v2046_v30 }
 0x21b   : > { %v1062_v24 = vcombine.low %v1038_v15, %v1054_v16  ;;  %v1063_v25 = vcombine.high %v1038_v15, %v1054_v16  ;;  %v1372_v27 = vpack.c.bf16 %v1364_v20, %v1364_v20  ;;  %v2044_v49 = vcombine.high %v2042_v33, %v2042_v33 }
 0x21c   : > { %v1373_v28 = vpack.c.bf16 %v1365_v21, %v1365_v21  ;;  %v1045_v34 = vrot.slane %v1031_v22, %v4059_v26  ;;  %v1061_v35 = vrot.slane %v1047_v23, %v4059_v26  ;;  %v2050_v32 = vsub.s32 %v2047_v31, %v4014_v51 }
 0x21d   : > { %v1070_v29 = vpack.c.bf16 %v1062_v24, %v1062_v24  ;;  %v1071_v1 = vpack.c.bf16 %v1063_v25, %v1063_v25  ;;  %v1954_v36 = vsel %vm684_vm4, %v1372_v27, 0 }
 0x21e   : > { %3558 = vmatmul.mubr.msk.bf16.vlgmr.msra.gmra.mxu0 %vm684_vm4, %v1068_v13  ;;  %3564 = vmatmul.mubr.msk.bf16.vlgmr.msra.gmra.mxu1 %vm684_vm4, %v1069_v14  ;;  %v2000_v37 = vsel %vm684_vm4, %v1373_v28, 0  ;;  %v1064_v38 = vcombine.low %v1045_v34, %v1061_v35  ;;  %v1065_v39 = vcombine.high %v1045_v34, %v1061_v35  ;;  %v2051_v44 = vrot.slane %v2042_v33, %v2050_v32 }
 0x21f   : > { %3568 = vmatpush3.bf16.xpose.msra.mxu0 %v1862_v17  ;;  %3574 = vmatpush3.bf16.xpose.msra.mxu1 %v1908_v18  ;;  %v2058_v55 = vrot.slane %v2044_v49, %v2050_v32 }
 0x220   : > { %3569 = vmatprep.mubr.msk.bf16.mxu0 %vm3833_vm5, %v3832_v48  ;;  %3575 = vmatprep.mubr.msk.bf16.mxu1 %vm3833_vm5, %v3832_v48  ;;  %v1072_v40 = vpack.c.bf16 %v1064_v38, %v1064_v38  ;;  %v1073_v42 = vpack.c.bf16 %v1065_v39, %v1065_v39  ;;  %v2059_v45 = vcombine.high %v2051_v44, %v2051_v44 }
 0x221   : > { %3579 = vmatprep.subr.bf16.mxu0 %v3832_v48  ;;  %3585 = vmatprep.subr.bf16.mxu1 %v3832_v48  ;;  %v2067_v46 = vrot.slane %v2051_v44, %v2050_v32  ;;  %v2060_v59 = vcombine.high %v2058_v55, %v2058_v55  ;;  %v2074_v63 = vrot.slane %v2058_v55, %v2050_v32 }
 0x222   : > { %v2081_v47 = vrot.slane %v2059_v45, %v2050_v32 }
 0x223   : > { %vm2101_vm6 = vcmp.ne.f32.partialorder %v2067_v46, 0.0  ;;  %v2089_v2 = vcombine.high %v2067_v46, %v2067_v46  ;;  %v2088_v0 = vrot.slane %v2060_v59, %v2050_v32  ;;  %vm2105_vm13 = vcmp.ne.f32.partialorder %v2074_v63, 0.0 }
 0x224   : > { %vm2102_vm7 = vcmp.ne.f32.partialorder %v2081_v47, 0.0  ;;  %v2109_v50 = vsel %vm2101_vm6, 1, %v3831_v41  ;;  %v2091_v58 = vcombine.high %v2081_v47, %v2081_v47  ;;  %v2113_v20 = vsel %vm2105_vm13, 1, %v3831_v41 }
 0x225   : > { %v2110_v54 = vsel %vm2102_vm7, 1, %v3831_v41  ;;  %v2120_v56 = vrot.slane %v2109_v50, %v4017_v52  ;;  %vm2103_vm8 = vcmp.ne.f32.partialorder %v2089_v2, 0.0  ;;  %vm2106_vm14 = vcmp.ne.f32.partialorder %v2088_v0, 0.0 }
 0x226   : > { %3570 = vmatmul.mubr.msk.bf16.vlgmr.msra.gmra.mxu0 %vm684_vm4, %v1070_v29  ;;  %3576 = vmatmul.mubr.msk.bf16.vlgmr.msra.gmra.mxu1 %vm684_vm4, %v1071_v1  ;;  %v2124_v57 = vrot.slane %v2110_v54, %v4017_v52  ;;  %vm2104_vm11 = vcmp.ne.f32.partialorder %v2091_v58, 0.0  ;;  %v2111_v60 = vsel %vm2103_vm8, 1, %v3831_v41  ;;  %v2114_v21 = vsel %vm2106_vm14, 1, %v3831_v41 }
 0x227   : > { %3580 = vmatpush3.bf16.xpose.msra.mxu0 %v1954_v36  ;;  %3586 = vmatpush3.bf16.xpose.msra.mxu1 %v2000_v37  ;;  %vm2149_vm9 = vcmp.eq.s32.totalorder %v2120_v56, 1  ;;  %v2112_v7 = vsel %vm2104_vm11, 1, %v3831_v41  ;;  %v2128_v13 = vrot.slane %v2111_v60, %v4017_v52  ;;  %v2090_v24 = vcombine.high %v2074_v63, %v2074_v63 }
 0x228   : > { %3581 = vmatprep.mubr.msk.bf16.mxu0 %vm3833_vm5, %v3832_v48  ;;  %3587 = vmatprep.mubr.msk.bf16.mxu1 %vm3833_vm5, %v3832_v48  ;;  %vm2150_vm10 = vcmp.eq.s32.totalorder %v2124_v57, 1  ;;  %v2132_v16 = vrot.slane %v2112_v7, %v4017_v52  ;;  %v2092_v25 = vcombine.high %v2088_v0, %v2088_v0  ;;  %v2136_v34 = vrot.slane %v2113_v20, %v4017_v52 }
 0x229   : > { %3591 = vmatprep.subr.bf16.mxu0 %v3832_v48  ;;  %3597 = vmatprep.subr.bf16.mxu1 %v3832_v48  ;;  %vm2151_vm15 = vcmp.eq.s32.totalorder %v2128_v13, 1  ;;  %v2140_v35 = vrot.slane %v2114_v21, %v4017_v52  ;;  %vm2107_vm1 = vcmp.ne.f32.partialorder %v2090_v24, 0.0  ;;  %vm2932_vm11 = vcmask 785408  }
 0x22a   : > { %vm2152_vm0 = vcmp.eq.s32.totalorder %v2132_v16, 1  ;;  %vm2108_vm2 = vcmp.ne.f32.partialorder %v2092_v25, 0.0  ;;  %vm2153_vm3 = vcmp.eq.s32.totalorder %v2136_v34, 1  ;;  %v2115_v43 = vsel %vm2107_vm1, 1, %v3831_v41 }
 0x22b   : > { %vm2154_vm6 = vcmp.eq.s32.totalorder %v2140_v35, 1  ;;  %v2116_v30 = vsel %vm2108_vm2, 1, %v3831_v41  ;;  %v2144_v50 = vrot.slane %v2115_v43, %v4017_v52 }
 0x22c   : > { %v2148_v54 = vrot.slane %v2116_v30, %v4017_v52 }
 0x22d   : > { %vm2155_vm7 = vcmp.eq.s32.totalorder %v2144_v50, 1 }
 0x22e   : > { %3582 = vmatmul.mubr.msk.bf16.vlgmr.msra.gmra.mxu0 %vm684_vm4, %v1072_v40  ;;  %3588 = vmatmul.mubr.msk.bf16.vlgmr.msra.gmra.mxu1 %vm684_vm4, %v1073_v42  ;;  %vm2156_vm8 = vcmp.eq.s32.totalorder %v2148_v54, 1 }
 0x22f   : > { %3593 = vmatprep.mubr.msk.bf16.mxu0 %vm3833_vm5, %v3832_v48  ;;  %3599 = vmatprep.mubr.msk.bf16.mxu1 %vm3833_vm5, %v3832_v48 }
 0x2d6   : > { %v1714_v61 = vpop.f32.mrf.mxu0  ;;  %v1760_v62 = vpop.f32.mrf.mxu1 }
 0x2d7   : > { %v4195_v4 = vsel %vm2149_vm9, %v1714_v61, -1000000.0  ;;  %v4197_v5 = vsel %vm2150_vm10, %v1760_v62, -1000000.0  ;;  %vm2265_vm9 = vcmask 1043456   ;;  %vm2929_vm10 = vcmask 523264  }
 0x2d8   : > { %v3547_v8 = vpop.f32.mrf.mxu0  ;;  %v3553_v10 = vpop.f32.mrf.mxu1  ;;  %v2169_v11 = vsel %vm2165_vm12, %v4197_v5, -inf  ;;  %v2166_v12 = vsel %vm2165_vm12, %v4195_v4, -inf }
 0x2d9   : > { %2170 = vmax.xlane.f32.xlu1 %v2169_v11  ;;  %2167 = vmax.xlane.f32.xlu0 %v2166_v12  ;;  %v1377_v12 = vpop.permute.xlu1 %1376 }
 0x2da   : > { %v1717_v14 = vpop.f32.mrf.mxu0  ;;  %v1763_v15 = vpop.f32.mrf.mxu1 }
 0x2dc   : > { %v3548_v17 = vpop.f32.mrf.mxu0  ;;  %v3554_v18 = vpop.f32.mrf.mxu1 }
 0x2de   : > { %v1806_v22 = vpop.f32.mrf.mxu0  ;;  %v1852_v23 = vpop.f32.mrf.mxu1 }
 0x2df   : > { %v4208_v27 = vsel %vm2151_vm15, %v1806_v22, -1000000.0  ;;  %v4214_v36 = vsel %vm2152_vm0, %v1852_v23, -1000000.0 }
 0x2e0   : > { %v3559_v28 = vpop.f32.mrf.mxu0  ;;  %v3565_v29 = vpop.f32.mrf.mxu1  ;;  %v2172_v1 = vsel %vm2165_vm12, %v4208_v27, -inf  ;;  %v2175_v42 = vsel %vm2165_vm12, %v4214_v36, -inf }
 0x2e1   : > { %2173 = vmax.xlane.f32.xlu0 %v2172_v1 }
 0x2e2   : > { %v1809_v37 = vpop.f32.mrf.mxu0  ;;  %v1855_v38 = vpop.f32.mrf.mxu1 }
 0x2e4   : > { %v3560_v39 = vpop.f32.mrf.mxu0  ;;  %v3566_v40 = vpop.f32.mrf.mxu1 }
 0x2e5   : > { %2176 = vmax.xlane.f32.xlu0 %v2175_v42 }
 0x2e6   : > { %v1898_v31 = vpop.f32.mrf.mxu0  ;;  %v1944_v32 = vpop.f32.mrf.mxu1 }
 0x2e7   : > { %v2161_v33 = vsel %vm2153_vm3, %v1898_v31, -1000000.0  ;;  %v4220_v44 = vsel %vm2154_vm6, %v1944_v32, -1000000.0 }
 0x2e8   : > { %v3571_v45 = vpop.f32.mrf.mxu0  ;;  %v3577_v46 = vpop.f32.mrf.mxu1  ;;  %v2181_v47 = vsel %vm2165_vm12, %v4220_v44, -inf  ;;  %v2178_v49 = vsel %vm2165_vm12, %v2161_v33, -inf }
 0x2e9   : > { %2182 = vmax.xlane.f32.xlu0 %v2181_v47  ;;  %2179 = vmax.xlane.f32.xlu1 %v2178_v49 }
 0x2ea   : > { %v1901_v2 = vpop.f32.mrf.mxu0  ;;  %v1947_v41 = vpop.f32.mrf.mxu1 }
 0x2ec   : > { %v3572_v55 = vpop.f32.mrf.mxu0  ;;  %v3578_v56 = vpop.f32.mrf.mxu1 }
 0x2ee   : > { %v1990_v57 = vpop.f32.mrf.mxu0  ;;  %v2036_v58 = vpop.f32.mrf.mxu1 }
 0x2ef   : > { %v4227_v59 = vsel %vm2155_vm7, %v1990_v57, -1000000.0  ;;  %v4229_v60 = vsel %vm2156_vm8, %v2036_v58, -1000000.0 }
 0x2f0   : > { %v3583_v61 = vpop.f32.mrf.mxu0  ;;  %v3589_v62 = vpop.f32.mrf.mxu1  ;;  %v2187_v63 = vsel %vm2165_vm12, %v4229_v60, -inf  ;;  %v2184_v0 = vsel %vm2165_vm12, %v4227_v59, -inf }
 0x2f1   : > { %2188 = vmax.xlane.f32.xlu0 %v2187_v63  ;;  %2185 = vmax.xlane.f32.xlu1 %v2184_v0 }
 0x2f2   : > { %v1993_v7 = vpop.f32.mrf.mxu0  ;;  %v2039_v8 = vpop.f32.mrf.mxu1 }
 0x2f4   : > { %v3584_v10 = vpop.f32.mrf.mxu0  ;;  %v3590_v11 = vpop.f32.mrf.mxu1 }
 0x302   : > { %1388 = vrot.lane.b32.xlu1 %v4049_v6, %s3834_s19 }
 0x307   : > { %1382 = vrot.lane.b32.xlu0 %v4049_v6, %s3836_s20 }
 0x362   : > { %v2168_v13 = vpop.xlane.xlu0 %2167  ;;  %v2171_v14 = vpop.xlane.xlu1 %2170 }
 0x363   : > { %v2190_v15 = vsub.f32 %v4195_v4, %v2168_v13  ;;  %v2191_v16 = vsub.f32 %v4197_v5, %v2171_v14 }
 0x365   : > { %v2198_v17 = vmul.f32 1.442695, %v2190_v15  ;;  %v2200_v18 = vmul.f32 1.442695, %v2191_v16 }
 0x367   : > { %3750 = vpow2.f32 %v2198_v17 }
 0x368   : > { %3752 = vpow2.f32 %v2200_v18 }
 0x36a   : > { %v2174_v20 = vpop.xlane.xlu0 %2173 }
 0x36b   : > { %v2192_v21 = vsub.f32 %v4208_v27, %v2174_v20 }
 0x36d   : > { %v2202_v22 = vmul.f32 1.442695, %v2192_v21 }
 0x36e   : > { %v2177_v23 = vpop.xlane.xlu0 %2176 }
 0x36f   : > { %3754 = vpow2.f32 %v2202_v22  ;;  %v2193_v24 = vsub.f32 %v4214_v36, %v2177_v23 }
 0x371   : > { %v2204_v25 = vmul.f32 1.442695, %v2193_v24 }
 0x372   : > { %v2180_v28 = vpop.xlane.xlu1 %2179  ;;  %v4249_v35 = vpop.xlane.xlu0 %2182 }
 0x373   : > { %3756 = vpow2.f32 %v2204_v25  ;;  %v2194_v29 = vsub.f32 %v2161_v33, %v2180_v28 }
 0x374   : > { %v4243_v1 = vpop.eup %3750 }
 0x375   : > { %v4245_v4 = vpop.eup %3752  ;;  %v2206_v5 = vmul.f32 1.442695, %v2194_v29  ;;  %v2214_v34 = vsel %vm2165_vm12, %v4243_v1, 0.0 }
 0x376   : > { %2215 = vadd.xlane.f32.xlu1 %v2214_v34  ;;  %v2217_v27 = vsel %vm2165_vm12, %v4245_v4, 0.0 }
 0x377   : > { %2218 = vadd.xlane.f32.xlu0 %v2217_v27  ;;  %3758 = vpow2.f32 %v2206_v5 }
 0x37a   : > { %v4253_v36 = vpop.xlane.xlu0 %2188  ;;  %v4255_v37 = vpop.xlane.xlu1 %2185 }
 0x37c   : > { %v4257_v38 = vpop.eup %3754 }
 0x37d   : > { %v2220_v39 = vsel %vm2165_vm12, %v4257_v38, 0.0 }
 0x37e   : > { %v1383_v40 = vpop.permute.xlu0 %1382  ;;  %2221 = vadd.xlane.f32.xlu1 %v2220_v39  ;;  %v1389_v42 = vpop.permute.xlu1 %1388  ;;  %v2195_v39 = vsub.f32 %v4220_v44, %v4249_v35 }
 0x37f   : > { %v1394_v43 = vcombine.low %v4049_v6, %v1383_v40  ;;  %v1395_v30 = vcombine.high %v4049_v6, %v1383_v40  ;;  %v1410_v31 = vcombine.low %v1377_v12, %v1389_v42  ;;  %v1411_v33 = vcombine.high %v1377_v12, %v1389_v42 }
 0x380   : > { %v4263_v32 = vpop.eup %3756  ;;  %v2208_v40 = vmul.f32 1.442695, %v2195_v39  ;;  %v2196_v42 = vsub.f32 %v4227_v59, %v4255_v37  ;;  %v2197_v59 = vsub.f32 %v4229_v60, %v4253_v36 }
 0x381   : > { %v1402_v45 = vrot.slane %v1394_v43, %v4056_v19  ;;  %v1409_v46 = vrot.slane %v1395_v30, %v4056_v19  ;;  %v1418_v47 = vrot.slane %v1410_v31, %v4056_v19  ;;  %v2223_v49 = vsel %vm2165_vm12, %v4263_v32, 0.0 }
 0x382   : > { %v1425_v50 = vrot.slane %v1411_v33, %v4056_v19  ;;  %2224 = vadd.xlane.f32.xlu0 %v2223_v49  ;;  %3760 = vpow2.f32 %v2208_v40  ;;  %v2210_v43 = vmul.f32 1.442695, %v2196_v42  ;;  %v2212_v35 = vmul.f32 1.442695, %v2197_v59 }
 0x383   : > { %v1426_v54 = vcombine.low %v1402_v45, %v1418_v47  ;;  %v1427_v2 = vcombine.high %v1402_v45, %v1418_v47 }
 0x384   : > { %v1442_v41 = vcombine.low %v1409_v46, %v1425_v50  ;;  %v1443_v6 = vcombine.high %v1409_v46, %v1425_v50  ;;  %v4271_v55 = vpop.eup %3758  ;;  %3762 = vpow2.f32 %v2210_v43 }
 0x385   : > { %v1434_v56 = vrot.slane %v1426_v54, %v4059_v26  ;;  %v1441_v57 = vrot.slane %v1427_v2, %v4059_v26  ;;  %v2226_v62 = vsel %vm2165_vm12, %v4271_v55, 0.0  ;;  %3764 = vpow2.f32 %v2212_v35 }
 0x386   : > { %v1450_v58 = vrot.slane %v1442_v41, %v4059_v26  ;;  %v1457_v61 = vrot.slane %v1443_v6, %v4059_v26  ;;  %2227 = vadd.xlane.f32.xlu0 %v2226_v62 }
 0x387   : > { %v1530_v63 = vcombine.low %v1434_v56, %v1441_v57  ;;  %v3434_v0 = vcombine.high %v1434_v56, %v1441_v57 }
 0x388   : > { %v1546_v7 = vcombine.low %v1450_v58, %v1457_v61  ;;  %v3435_v8 = vcombine.high %v1450_v58, %v1457_v61 }
 0x389   : > { %v1537_v10 = vrot.slane %v1530_v63, %v4056_v19  ;;  %v1545_v11 = vrot.slane %v3434_v0, %v4056_v19 }
 0x38a   : > { %v1553_v12 = vrot.slane %v1546_v7, %v4056_v19  ;;  %v1561_v13 = vrot.slane %v3435_v8, %v4056_v19 }
 0x38b   : > { %v1562_v14 = vcombine.low %v1537_v10, %v1545_v11  ;;  %v1563_v15 = vcombine.high %v1537_v10, %v1545_v11 }
 0x38c   : > { %v1578_v16 = vcombine.low %v1553_v12, %v1561_v13  ;;  %v1579_v17 = vcombine.high %v1553_v12, %v1561_v13 }
 0x38d   : > { %v1570_v18 = vrot.slane %v1562_v14, %v4059_v26  ;;  %v1577_v20 = vrot.slane %v1563_v15, %v4059_v26 }
 0x38e   : > { %v1586_v21 = vrot.slane %v1578_v16, %v4059_v26  ;;  %v1593_v22 = vrot.slane %v1579_v17, %v4059_v26 }
 0x38f   : > { %1384 = vrot.lane.b32.xlu1 %v4053_v9, %s3836_s20  ;;  %v4299_v30 = vpop.eup %3760 }
 0x390   : > { %v1594_v23 = vcombine.low %v1570_v18, %v1586_v21  ;;  %v1595_v24 = vcombine.high %v1570_v18, %v1586_v21  ;;  %v1596_v25 = vcombine.low %v1577_v20, %v1593_v22  ;;  %v1597_v28 = vcombine.high %v1577_v20, %v1593_v22 }
 0x391   : > { %v2229_v31 = vsel %vm2165_vm12, %v4299_v30, 0.0  ;;  %v4303_v33 = vpop.eup %3762 }
 0x392   : > { %v1666_v29 = vpack.c.bf16 %v1594_v23, %v1594_v23  ;;  %v1667_v5 = vpack.c.bf16 %v1595_v24, %v1595_v24  ;;  %v2232_v44 = vsel %vm2165_vm12, %v4303_v33, 0.0  ;;  %v4311_v37 = vpop.eup %3764  ;;  %v1668_v36 = vpack.c.bf16 %v1596_v25, %v1596_v25 }
 0x393   : > { %v2235_v45 = vsel %vm2165_vm12, %v4311_v37, 0.0  ;;  %v1669_v6 = vpack.c.bf16 %v1597_v28, %v1597_v28 }
 0x394   : > { %v2267_v34 = vsel %vm2265_vm9, %v1666_v29, 0  ;;  %v2313_v27 = vsel %vm2265_vm9, %v1667_v5, 0  ;;  %v2359_v58 = vsel %vm2265_vm9, %v1668_v36, 0 }
 0x395   : > { %3592 = vmatpush3.bf16.msra.mxu0 %v2267_v34  ;;  %3598 = vmatpush3.bf16.msra.mxu1 %v2313_v27  ;;  %v2405_v61 = vsel %vm2265_vm9, %v1669_v6, 0 }
 0x396   : > { %3603 = vmatprep.subr.bf16.mxu0 %v3832_v48  ;;  %3609 = vmatprep.subr.bf16.mxu1 %v3832_v48 }
 0x39c   : > { %1378 = vrot.lane.b32.xlu0 %v4053_v9, %s3835_s18 }
 0x3b3   : > { %2230 = vadd.xlane.f32.xlu1 %v2229_v31 }
 0x3bb   : > { %2233 = vadd.xlane.f32.xlu0 %v2232_v44 }
 0x3c4   : > { %1390 = vrot.lane.b32.xlu1 %v4053_v9, %s3834_s19 }
 0x3e8   : > { %2236 = vadd.xlane.f32.xlu1 %v2235_v45 }
 0x3ff   : > { %v2216_v46 = vpop.xlane.xlu1 %2215 }
 0x400   : > { %v2219_v47 = vpop.xlane.xlu0 %2218  ;;  %3766 = vrcp.f32 %v2216_v46 }
 0x401   : > { %3768 = vrcp.f32 %v2219_v47 }
 0x407   : > { %v2222_v49 = vpop.xlane.xlu1 %2221 }
 0x408   : > { %3770 = vrcp.f32 %v2222_v49 }
 0x40b   : > { %v2225_v50 = vpop.xlane.xlu0 %2224  ;;  %v1385_v8 = vpop.permute.xlu1 %1384 }
 0x40c   : > { %3772 = vrcp.f32 %v2225_v50  ;;  %v1462_v11 = vcombine.low %v4053_v9, %v1385_v8  ;;  %v1463_v12 = vcombine.high %v4053_v9, %v1385_v8 }
 0x40d   : > { %v3767_v54 = vpop.eup %3766 }
 0x40e   : > { %v3769_v2 = vpop.eup %3768  ;;  %v2246_v60 = vmul.f32 %v3767_v54, %v4243_v1  ;;  %v1470_v16 = vrot.slane %v1462_v11, %v4056_v19  ;;  %v1477_v17 = vrot.slane %v1463_v12, %v4056_v19 }
 0x40f   : > { %v2247_v41 = vmul.f32 %v3769_v2, %v4245_v4  ;;  %v2228_v10 = vpop.xlane.xlu0 %2227 }
 0x410   : > { %v2254_v56 = vpack.c.bf16 %v2246_v60, %v2246_v60  ;;  %3774 = vrcp.f32 %v2228_v10 }
 0x411   : > { %v2255_v57 = vpack.c.bf16 %v2247_v41, %v2247_v41 }
 0x412   : > { %3594 = vmatmul.mubr.msk.bf16.vlgmr.msra.gmra.mxu0 %vm2165_vm12, %v2254_v56 }
 0x413   : > { %3600 = vmatmul.mubr.msk.bf16.vlgmr.msra.gmra.mxu1 %vm2165_vm12, %v2255_v57  ;;  %3604 = vmatpush3.bf16.msra.mxu0 %v2359_v58  ;;  %v1379_v13 = vpop.permute.xlu0 %1378 }
 0x414   : > { %3610 = vmatpush3.bf16.msra.mxu1 %v2405_v61  ;;  %3605 = vmatprep.mubr.msk.bf16.mxu0 %vm3833_vm5, %v3832_v48 }
 0x415   : > { %v3771_v1 = vpop.eup %3770  ;;  %3611 = vmatprep.mubr.msk.bf16.mxu1 %vm3833_vm5, %v3832_v48  ;;  %3615 = vmatprep.subr.bf16.mxu0 %v3832_v48 }
 0x416   : > { %v2248_v4 = vmul.f32 %v3771_v1, %v4257_v38  ;;  %3621 = vmatprep.subr.bf16.mxu1 %v3832_v48 }
 0x418   : > { %v2256_v62 = vpack.c.bf16 %v2248_v4, %v2248_v4 }
 0x419   : > { %v3773_v63 = vpop.eup %3772 }
 0x41a   : > { %3606 = vmatmul.mubr.msk.bf16.vlgmr.msra.gmra.mxu0 %vm2165_vm12, %v2256_v62  ;;  %v2249_v0 = vmul.f32 %v3773_v63, %v4263_v32 }
 0x41b   : > { %3617 = vmatprep.mubr.msk.bf16.mxu0 %vm3833_vm5, %v3832_v48 }
 0x41c   : > { %v2257_v7 = vpack.c.bf16 %v2249_v0, %v2249_v0 }
 0x41d   : > { %v3775_v47 = vpop.eup %3774 }
 0x41e   : > { %3612 = vmatmul.mubr.msk.bf16.vlgmr.msra.gmra.mxu1 %vm2165_vm12, %v2257_v7  ;;  %v2250_v61 = vmul.f32 %v3775_v47, %v4271_v55 }
 0x41f   : > { %3623 = vmatprep.mubr.msk.bf16.mxu1 %vm3833_vm5, %v3832_v48 }
 0x420   : > { %v2258_v8 = vpack.c.bf16 %v2250_v61, %v2250_v61 }
 0x43c   : > { %v2231_v38 = vpop.xlane.xlu1 %2230 }
 0x43d   : > { %3776 = vrcp.f32 %v2231_v38 }
 0x440   : > { %v1391_v14 = vpop.permute.xlu1 %1390 }
 0x441   : > { %v1478_v15 = vcombine.low %v1379_v13, %v1391_v14  ;;  %v1479_v32 = vcombine.high %v1379_v13, %v1391_v14 }
 0x443   : > { %v1486_v18 = vrot.slane %v1478_v15, %v4056_v19  ;;  %v1493_v20 = vrot.slane %v1479_v32, %v4056_v19 }
 0x444   : > { %v2234_v5 = vpop.xlane.xlu0 %2233 }
 0x445   : > { %v1494_v21 = vcombine.low %v1470_v16, %v1486_v18  ;;  %v1495_v22 = vcombine.high %v1470_v16, %v1486_v18  ;;  %v1510_v23 = vcombine.low %v1477_v17, %v1493_v20  ;;  %v1511_v24 = vcombine.high %v1477_v17, %v1493_v20 }
 0x446   : > { %3778 = vrcp.f32 %v2234_v5 }
 0x447   : > { %v1502_v9 = vrot.slane %v1494_v21, %v4059_v26  ;;  %v1509_v25 = vrot.slane %v1495_v22, %v4059_v26  ;;  %v1518_v28 = vrot.slane %v1510_v23, %v4059_v26  ;;  %v1525_v29 = vrot.slane %v1511_v24, %v4059_v26 }
 0x449   : > { %v1598_v34 = vcombine.low %v1502_v9, %v1509_v25  ;;  %v3436_v27 = vcombine.high %v1502_v9, %v1509_v25  ;;  %v1614_v39 = vcombine.low %v1518_v28, %v1525_v29  ;;  %v3437_v40 = vcombine.high %v1518_v28, %v1525_v29  ;;  %v3736_v25 = vld [vmem:[%s3932_s15 + $0x38] sm:$0xff]  }
 0x44a   : > { %v3777_v60 = vpop.eup %3776 }
 0x44b   : > { %v1605_v42 = vrot.slane %v1598_v34, %v4056_v19  ;;  %v1613_v43 = vrot.slane %v3436_v27, %v4056_v19  ;;  %v1621_v31 = vrot.slane %v1614_v39, %v4056_v19  ;;  %v1629_v44 = vrot.slane %v3437_v40, %v4056_v19  ;;  %v3737_v27 = vld [vmem:[%s3932_s15 + $0x30] sm:$0xff]  }
 0x44c   : > { %v2251_v1 = vmul.f32 %v3777_v60, %v4299_v30 }
 0x44d   : > { %v1630_v59 = vcombine.low %v1605_v42, %v1613_v43  ;;  %v1646_v35 = vcombine.low %v1621_v31, %v1629_v44  ;;  %v1631_v45 = vcombine.high %v1605_v42, %v1613_v43  ;;  %v1647_v46 = vcombine.high %v1621_v31, %v1629_v44 }
 0x44e   : > { %v2259_v10 = vpack.c.bf16 %v2251_v1, %v2251_v1 }
 0x44f   : > { %v1638_v49 = vrot.slane %v1630_v59, %v4059_v26  ;;  %v1654_v50 = vrot.slane %v1646_v35, %v4059_v26  ;;  %v1645_v54 = vrot.slane %v1631_v45, %v4059_v26  ;;  %v1661_v2 = vrot.slane %v1647_v46, %v4059_v26 }
 0x451   : > { %v1662_v36 = vcombine.low %v1638_v49, %v1654_v50  ;;  %v1663_v41 = vcombine.high %v1638_v49, %v1654_v50  ;;  %v1664_v6 = vcombine.low %v1645_v54, %v1661_v2  ;;  %v1665_v56 = vcombine.high %v1645_v54, %v1661_v2  ;;  %v3738_v49 = vld [vmem:[%s3932_s15 + $0x28] sm:$0xff]  }
 0x453   : > { %v1670_v57 = vpack.c.bf16 %v1662_v36, %v1662_v36  ;;  %v1671_v58 = vpack.c.bf16 %v1663_v41, %v1663_v41  ;;  %v1672_v63 = vpack.c.bf16 %v1664_v6, %v1664_v6  ;;  %v1673_v0 = vpack.c.bf16 %v1665_v56, %v1665_v56  ;;  %v3779_v7 = vpop.eup %3778 }
 0x454   : > { %v2252_v38 = vmul.f32 %v3779_v7, %v4303_v33 }
 0x455   : > { %v2451_v4 = vsel %vm2265_vm9, %v1670_v57, 0  ;;  %v2497_v62 = vsel %vm2265_vm9, %v1671_v58, 0  ;;  %v2543_v55 = vsel %vm2265_vm9, %v1672_v63, 0  ;;  %v2589_v30 = vsel %vm2265_vm9, %v1673_v0, 0  ;;  %v3739_v58 = vld [vmem:[%s3932_s15 + $0x20] sm:$0xff]  }
 0x456   : > { %3616 = vmatpush3.bf16.msra.mxu0 %v2451_v4  ;;  %3622 = vmatpush3.bf16.msra.mxu1 %v2497_v62  ;;  %v2260_v11 = vpack.c.bf16 %v2252_v38, %v2252_v38 }
 0x457   : > { %3627 = vmatprep.subr.bf16.mxu0 %v3832_v48  ;;  %3633 = vmatprep.subr.bf16.mxu1 %v3832_v48 }
 0x459   : > { %3618 = vmatmul.mubr.msk.bf16.vlgmr.msra.gmra.mxu0 %vm2165_vm12, %v2258_v8  ;;  %3624 = vmatmul.mubr.msk.bf16.vlgmr.msra.gmra.mxu1 %vm2165_vm12, %v2259_v10  ;;  %v3740_v10 = vld [vmem:[%s3932_s15 + $0x18] sm:$0xff]  }
 0x45a   : > { %3628 = vmatpush3.bf16.msra.mxu0 %v2543_v55  ;;  %3634 = vmatpush3.bf16.msra.mxu1 %v2589_v30 }
 0x45b   : > { %3629 = vmatprep.mubr.msk.bf16.mxu0 %vm3833_vm5, %v3832_v48  ;;  %3635 = vmatprep.mubr.msk.bf16.mxu1 %vm3833_vm5, %v3832_v48 }
 0x45c   : > { %3639 = vmatprep.subr.bf16.mxu0 %v3832_v48  ;;  %3659 = vmatprep.subr.bf16.mxu1 %v3832_v48 }
 0x461   : > { %3630 = vmatmul.mubr.msk.bf16.vlgmr.msra.gmra.mxu0 %vm2165_vm12, %v2260_v11 }
 0x462   : > { %3655 = vmatprep.mubr.msk.bf16.mxu0 %vm3833_vm5, %v3832_v48  ;;  %3640 = vmatpush3.bf16.msra.mxu0 %v3736_v25 }
 0x463   : > { %3641 = vmatprep.subr.bf16.mxu0 %v3832_v48 }
 0x466   : > { %3642 = vmatpush3.bf16.msra.mxu0 %v3737_v27 }
 0x467   : > { %3643 = vmatprep.subr.bf16.mxu0 %v3832_v48 }
 0x46a   : > { %3644 = vmatpush3.bf16.msra.mxu0 %v3738_v49 }
 0x46b   : > { %3645 = vmatprep.subr.bf16.mxu0 %v3832_v48 }
 0x46e   : > { %3646 = vmatpush3.bf16.msra.mxu0 %v3739_v58 }
 0x46f   : > { %3647 = vmatprep.subr.bf16.mxu0 %v3832_v48 }
 0x471   : > { %v2237_v12 = vpop.xlane.xlu1 %2236 }
 0x472   : > { %3780 = vrcp.f32 %v2237_v12  ;;  %3648 = vmatpush3.bf16.msra.mxu0 %v3740_v10 }
 0x473   : > { %3649 = vmatprep.subr.bf16.mxu0 %v3832_v48 }
 0x47f   : > { %v3781_v13 = vpop.eup %3780 }
 0x480   : > { %v2253_v14 = vmul.f32 %v3781_v13, %v4311_v37 }
 0x482   : > { %v2261_v33 = vpack.c.bf16 %v2253_v14, %v2253_v14 }
 0x484   : > { %3636 = vmatmul.mubr.msk.bf16.vlgmr.msra.gmra.mxu1 %vm2165_vm12, %v2261_v33 }
 0x485   : > { %3663 = vmatprep.mubr.msk.bf16.mxu1 %vm3833_vm5, %v3832_v48 }
 0x4d2   : > { %v2303_v15 = vpop.f32.mrf.mxu0 }
 0x4d3   : > { %v2349_v32 = vpop.f32.mrf.mxu1 }
 0x4d4   : > { %v3595_v16 = vpop.f32.mrf.mxu0 }
 0x4d5   : > { %v3601_v17 = vpop.f32.mrf.mxu1 }
 0x4d6   : > { %v2306_v18 = vpop.f32.mrf.mxu0 }
 0x4d7   : > { %v2352_v20 = vpop.f32.mrf.mxu1 }
 0x4d8   : > { %v3596_v21 = vpop.f32.mrf.mxu0 }
 0x4d9   : > { %v3602_v22 = vpop.f32.mrf.mxu1 }
 0x4da   : > { %v2395_v23 = vpop.f32.mrf.mxu0 }
 0x4db   : > { %v2631_v24 = vcombine.low %v2303_v15, %v2395_v23  ;;  %v2632_v9 = vcombine.high %v2303_v15, %v2395_v23  ;;  %v3741_v15 = vld [vmem:[%s3932_s15 + $0x10] sm:$0xff]  }
 0x4dc   : > { %v3607_v37 = vpop.f32.mrf.mxu0  ;;  %3650 = vmatpush3.bf16.msra.mxu0 %v3741_v15 }
 0x4dd   : > { %v2639_v42 = vrot.slane %v2631_v24, %v4056_v19  ;;  %v2646_v43 = vrot.slane %v2632_v9, %v4056_v19  ;;  %3651 = vmatprep.subr.bf16.mxu0 %v3832_v48 }
 0x4de   : > { %v2398_v28 = vpop.f32.mrf.mxu0  ;;  %v2441_v29 = vpop.f32.mrf.mxu1 }
 0x4df   : > { %v2647_v5 = vcombine.low %v2349_v32, %v2441_v29  ;;  %v2648_v34 = vcombine.high %v2349_v32, %v2441_v29 }
 0x4e0   : > { %v3608_v39 = vpop.f32.mrf.mxu0  ;;  %v3613_v40 = vpop.f32.mrf.mxu1 }
 0x4e1   : > { %v2655_v31 = vrot.slane %v2647_v5, %v4056_v19  ;;  %v2662_v44 = vrot.slane %v2648_v34, %v4056_v19 }
 0x4e2   : > { %v2444_v59 = vpop.f32.mrf.mxu1 }
 0x4e3   : > { %v2663_v35 = vcombine.low %v2639_v42, %v2655_v31  ;;  %v2664_v45 = vcombine.high %v2639_v42, %v2655_v31  ;;  %v2679_v46 = vcombine.low %v2646_v43, %v2662_v44  ;;  %v2680_v47 = vcombine.high %v2646_v43, %v2662_v44 }
 0x4e4   : > { %v3614_v50 = vpop.f32.mrf.mxu1 }
 0x4e5   : > { %v2671_v54 = vrot.slane %v2663_v35, %v4059_v26  ;;  %v2678_v2 = vrot.slane %v2664_v45, %v4059_v26  ;;  %v2687_v60 = vrot.slane %v2679_v46, %v4059_v26  ;;  %v2694_v36 = vrot.slane %v2680_v47, %v4059_v26 }
 0x4e7   : > { %v2767_v41 = vcombine.low %v2671_v54, %v2678_v2  ;;  %v3454_v6 = vcombine.high %v2671_v54, %v2678_v2  ;;  %v2783_v56 = vcombine.low %v2687_v60, %v2694_v36  ;;  %v3455_v57 = vcombine.high %v2687_v60, %v2694_v36 }
 0x4e9   : > { %v2774_v61 = vrot.slane %v2767_v41, %v4056_v19  ;;  %v2782_v1 = vrot.slane %v3454_v6, %v4056_v19  ;;  %v2790_v4 = vrot.slane %v2783_v56, %v4056_v19  ;;  %v2798_v62 = vrot.slane %v3455_v57, %v4056_v19  ;;  %v3742_v56 = vld [vmem:[%s3932_s15 + $0x8] sm:$0xff]  }
 0x4ea   : > { %3652 = vmatpush3.bf16.msra.mxu0 %v3742_v56 }
 0x4eb   : > { %v2800_v63 = vcombine.high %v2774_v61, %v2782_v1  ;;  %v2816_v0 = vcombine.high %v2790_v4, %v2798_v62  ;;  %v2799_v7 = vcombine.low %v2774_v61, %v2782_v1  ;;  %v2815_v8 = vcombine.low %v2790_v4, %v2798_v62  ;;  %3653 = vmatprep.subr.bf16.mxu0 %v3832_v48 }
 0x4ed   : > { %v4399_v55 = vrot.slane %v2800_v63, %v4059_v26  ;;  %v4402_v30 = vrot.slane %v2816_v0, %v4059_v26  ;;  %v4405_v38 = vrot.slane %v2799_v7, %v4059_v26  ;;  %v4408_v11 = vrot.slane %v2815_v8, %v4059_v26 }
 0x4ef   : > { %v2833_v12 = vcombine.low %v4399_v55, %v4402_v30  ;;  %v2831_v13 = vcombine.low %v4405_v38, %v4408_v11  ;;  %v2832_v14 = vcombine.high %v4405_v38, %v4408_v11  ;;  %v2834_v33 = vcombine.high %v4399_v55, %v4402_v30 }
 0x519   : > { %v2487_v32 = vpop.f32.mrf.mxu0  ;;  %v2533_v16 = vpop.f32.mrf.mxu1 }
 0x51b   : > { %v3619_v17 = vpop.f32.mrf.mxu0  ;;  %v3625_v18 = vpop.f32.mrf.mxu1 }
 0x51d   : > { %v2490_v20 = vpop.f32.mrf.mxu0  ;;  %v2536_v21 = vpop.f32.mrf.mxu1 }
 0x51f   : > { %v3620_v22 = vpop.f32.mrf.mxu0  ;;  %v3626_v23 = vpop.f32.mrf.mxu1 }
 0x521   : > { %v2579_v24 = vpop.f32.mrf.mxu0 }
 0x522   : > { %v2699_v28 = vcombine.low %v2487_v32, %v2579_v24  ;;  %v2700_v29 = vcombine.high %v2487_v32, %v2579_v24  ;;  %v3743_v32 = vld [vmem:[%s3932_s15] sm:$0xff]  }
 0x523   : > { %v3631_v9 = vpop.f32.mrf.mxu0  ;;  %3654 = vmatpush3.bf16.msra.mxu0 %v3743_v32 }
 0x524   : > { %v2707_v40 = vrot.slane %v2699_v28, %v4056_v19  ;;  %v2714_v42 = vrot.slane %v2700_v29, %v4056_v19 }
 0x525   : > { %v2582_v37 = vpop.f32.mrf.mxu0 }
 0x527   : > { %v3632_v25 = vpop.f32.mrf.mxu0 }
 0x544   : > { %v2625_v5 = vpop.f32.mrf.mxu1 }
 0x545   : > { %v2715_v34 = vcombine.low %v2533_v16, %v2625_v5  ;;  %v2716_v27 = vcombine.high %v2533_v16, %v2625_v5 }
 0x546   : > { %v3637_v39 = vpop.f32.mrf.mxu1 }
 0x547   : > { %v2723_v43 = vrot.slane %v2715_v34, %v4056_v19  ;;  %v2730_v31 = vrot.slane %v2716_v27, %v4056_v19  ;;  %v4460_v39 = vld [vmem:[%s3965_s21] sm:$0x3f] }
 0x548   : > { %v2628_v44 = vpop.f32.mrf.mxu1  ;;  %v2956_v38 = vrot.slane %v4460_v39, %v4017_v52 }
 0x549   : > { %v2731_v59 = vcombine.low %v2707_v40, %v2723_v43  ;;  %v2732_v35 = vcombine.high %v2707_v40, %v2723_v43  ;;  %v2747_v45 = vcombine.low %v2714_v42, %v2730_v31  ;;  %v2748_v46 = vcombine.high %v2714_v42, %v2730_v31  ;;  %v3790_v42 = vld [vmem:[#allocation2] sm:$0xff] }
 0x54a   : > { %v3638_v47 = vpop.f32.mrf.mxu1 }
 0x54b   : > { %v2739_v49 = vrot.slane %v2731_v59, %v4059_v26  ;;  %v2746_v50 = vrot.slane %v2732_v35, %v4059_v26  ;;  %v2755_v54 = vrot.slane %v2747_v45, %v4059_v26  ;;  %v2762_v2 = vrot.slane %v2748_v46, %v4059_v26  ;;  %v3791_v45 = vld [vmem:[#allocation2 + $0x8] sm:$0xff] }
 0x54d   : > { %v2835_v60 = vcombine.low %v2739_v49, %v2746_v50  ;;  %v3456_v36 = vcombine.high %v2739_v49, %v2746_v50  ;;  %v2851_v41 = vcombine.low %v2755_v54, %v2762_v2  ;;  %v3457_v6 = vcombine.high %v2755_v54, %v2762_v2 }
 0x54f   : > { %v2842_v57 = vrot.slane %v2835_v60, %v4056_v19  ;;  %v2850_v58 = vrot.slane %v3456_v36, %v4056_v19  ;;  %v2858_v61 = vrot.slane %v2851_v41, %v4056_v19  ;;  %v2866_v1 = vrot.slane %v3457_v6, %v4056_v19 }
 0x551   : > { %v2868_v4 = vcombine.high %v2842_v57, %v2850_v58  ;;  %v2884_v62 = vcombine.high %v2858_v61, %v2866_v1  ;;  %v2867_v63 = vcombine.low %v2842_v57, %v2850_v58  ;;  %v2883_v0 = vcombine.low %v2858_v61, %v2866_v1  ;;  %v3744_v57 = vld [vmem:[%s3943_s22 + $0x8] sm:$0xff]   ;;  %v3745_v58 = vld [vmem:[%s3943_s22] sm:$0xff]  }
 0x552   : > { %3660 = vmatpush3.bf16.msra.mxu1 %v3744_v57  ;;  %v3274_v57 = vsub.s32 5, %v4014_v51 }
 0x553   : > { %v2882_v7 = vrot.slane %v2868_v4, %v4059_v26  ;;  %v2898_v8 = vrot.slane %v2884_v62, %v4059_v26  ;;  %v2875_v10 = vrot.slane %v2867_v63, %v4059_v26  ;;  %v2891_v15 = vrot.slane %v2883_v0, %v4059_v26  ;;  %3661 = vmatprep.subr.bf16.mxu1 %v3832_v48 }
 0x555   : > { %v2901_v16 = vcombine.low %v2882_v7, %v2898_v8  ;;  %v2900_v17 = vcombine.high %v2875_v10, %v2891_v15  ;;  %v2899_v18 = vcombine.low %v2875_v10, %v2891_v15  ;;  %v2902_v21 = vcombine.high %v2882_v7, %v2898_v8 }
 0x556   : > { %3662 = vmatpush3.bf16.msra.mxu1 %v3745_v58  ;;  %v3078_v7 = vrot.slane %v4460_v39, %v643_v53  ;;  %v3084_v10 = vrot.slane %v4460_v39, %v647_v3  ;;  %v3747_v53 = vld [vmem:[%s3950_s4 + $0x10] sm:$0xff]   ;;  %v3748_v3 = vld [vmem:[%s3950_s4 + $0x8] sm:$0xff]  }
 0x557   : > { %v3717_v19 = vpack.i.bf16 %v2901_v16, %v2833_v12  ;;  %v3712_v20 = vpack.i.bf16 %v2900_v17, %v2832_v14  ;;  %v3722_v26 = vpack.i.bf16 %v2902_v21, %v2834_v33  ;;  %3667 = vmatprep.subr.bf16.mxu1 %v3832_v48  ;;  %v3746_v21 = vld [vmem:[%s3950_s4 + $0x18] sm:$0xff]  }
 0x559   : > { %3718 = vrot.lane.b32.xlu1 %v3717_v19, %s3836_s20  ;;  %3713 = vrot.lane.b32.xlu0 %v3712_v20, %s3834_s19 }
 0x55d   : > { %3723 = vrot.lane.b32.xlu0 %v3722_v26, %s3835_s18 }
 0x5cb   : > { %v3719_v22 = vpop.permute.xlu1 %3718  ;;  %v3714_v23 = vpop.permute.xlu0 %3713 }
 0x5cc   : > { %v3716_v24 = vunpack.i.h.bf16 %v3714_v23  ;;  %v3715_v9 = vunpack.i.l.bf16 %v3714_v23  ;;  %v3721_v12 = vunpack.i.h.bf16 %v3719_v22  ;;  %v3720_v37 = vunpack.i.l.bf16 %v3719_v22  ;;  %v3749_v22 = vld [vmem:[%s3950_s4] sm:$0xff]  }
 0x5cd   : > { %v3466_v23 = vld [vmem:[%s530_s14] ss:$0 sm:$0xff] }
 0x5ce   : > { %v2927_v14 = vsel %vm684_vm4, %v2831_v13, %v3715_v9  ;;  %v2928_v25 = vsel %vm684_vm4, %v2899_v18, %v3716_v24 }
 0x5cf   : > { %v3724_v55 = vpop.permute.xlu0 %3723  ;;  %v2930_v28 = vsel %vm2929_vm10, %v2927_v14, %v3720_v37  ;;  %v2931_v29 = vsel %vm2929_vm10, %v2928_v25, %v3721_v12 }
 0x5d0   : > { %v3726_v30 = vunpack.i.h.bf16 %v3724_v55  ;;  %v3725_v33 = vunpack.i.l.bf16 %v3724_v55 }
 0x5d2   : > { %v2933_v5 = vsel %vm2932_vm11, %v2930_v28, %v3725_v33  ;;  %v2934_v34 = vsel %vm2932_vm11, %v2931_v29, %v3726_v30  ;;  %v3168_v28 = vsub.s32 3, %v4014_v51 }
 0x5d3   : > { %v2936_v27 = vpack.c.bf16 %v2934_v34, %v2933_v5 }
 0x5d5   : > { %3656 = vmatmul.mubr.bf16.vlgmr.msra.gmra.mxu0 %v2936_v27 }
 0x695   : > { %v3039_v11 = vpop.f32.mrf.mxu0 }
 0x696   : > { %v3040_v13 = vadd.f32 %v3039_v11, %v2956_v38 }
 0x697   : > { %v3657_v40 = vpop.f32.mrf.mxu0 }
 0x698   : > { %v3046_v43 = vadd.f32 %v3790_v42, %v3040_v13 }
 0x699   : > { %v3042_v31 = vpop.f32.mrf.mxu0 }
 0x69a   : > { %v3043_v44 = vadd.f32 %v3042_v31, %v2956_v38  ;;  %v3048_v59 = vsel %vm684_vm4, %v3046_v43, 0.0 }
 0x69b   : > { %3049 = vadd.xlane.f32.xlu1 %v3048_v59  ;;  %v3658_v35 = vpop.f32.mrf.mxu0 }
 0x69c   : > { %v3047_v46 = vadd.f32 %v3791_v45, %v3043_v44 }
 0x69e   : > { %v3051_v47 = vsel %vm684_vm4, %v3047_v46, 0.0 }
 0x69f   : > { %3052 = vadd.xlane.f32.xlu0 %v3051_v47 }
 0x724   : > { %v3050_v49 = vpop.xlane.xlu1 %3049 }
 0x725   : > { %v3055_v52 = vmul.f32 0.03125, %v3050_v49 }
 0x727   : > { %v3057_v50 = vsub.f32 %v3046_v43, %v3055_v52 }
 0x728   : > { %v3053_v54 = vpop.xlane.xlu0 %3052 }
 0x729   : > { %v3056_v2 = vmul.f32 0.03125, %v3053_v54  ;;  %v3059_v60 = vmul.f32 %v3057_v50, %v3057_v50 }
 0x72b   : > { %v3058_v36 = vsub.f32 %v3047_v46, %v3056_v2  ;;  %v3061_v41 = vsel %vm684_vm4, %v3059_v60, 0.0 }
 0x72c   : > { %3062 = vadd.xlane.f32.xlu0 %v3061_v41 }
 0x72d   : > { %v3060_v6 = vmul.f32 %v3058_v36, %v3058_v36 }
 0x72f   : > { %v3064_v56 = vsel %vm684_vm4, %v3060_v6, 0.0 }
 0x730   : > { %3065 = vadd.xlane.f32.xlu1 %v3064_v56  ;;  %v3268_v56 = vsub.s32 4, %v4014_v51 }
 0x732   : > { %v3269_v58 = vrot.slane %v4460_v39, %v3268_v56 }
 0x7b5   : > { %v3063_v61 = vpop.xlane.xlu0 %3062 }
 0x7b6   : > { %v3067_v1 = vmul.f32 0.03125, %v3063_v61 }
 0x7b8   : > { %v3069_v4 = vadd.f32 1e-05, %v3067_v1  ;;  %v3275_v1 = vrot.slane %v4460_v39, %v3274_v57 }
 0x7b9   : > { %v3066_v62 = vpop.xlane.xlu1 %3065 }
 0x7ba   : > { %3782 = vrsqrt.f32 %v3069_v4  ;;  %v3068_v63 = vmul.f32 0.03125, %v3066_v62 }
 0x7bc   : > { %v3070_v0 = vadd.f32 1e-05, %v3068_v63 }
 0x7be   : > { %3784 = vrsqrt.f32 %v3070_v0 }
 0x7c7   : > { %v3783_v8 = vpop.eup %3782 }
 0x7c8   : > { %v3073_v15 = vmul.f32 %v3783_v8, %v3057_v50 }
 0x7ca   : > { %v3079_v32 = vmul.f32 %v3078_v7, %v3073_v15 }
 0x7cb   : > { %v3785_v16 = vpop.eup %3784 }
 0x7cc   : > { %v3074_v17 = vmul.f32 %v3785_v16, %v3058_v36  ;;  %v3085_v18 = vadd.f32 %v3084_v10, %v3079_v32 }
 0x7ce   : > { %v3080_v19 = vmul.f32 %v3078_v7, %v3074_v17 }
 0x7d0   : > { %v3086_v20 = vadd.f32 %v3084_v10, %v3080_v19 }
 0x7d2   : > { %v3087_v26 = vpack.c.bf16 %v3086_v20, %v3085_v18 }
 0x7d4   : > { %3664 = vmatmul.mubr.msk.bf16.vlgmr.msra.gmra.mxu1 %vm684_vm4, %v3087_v26 }
 0x7d5   : > { %3668 = vmatpush3.bf16.msra.mxu1 %v3746_v21  ;;  %3675 = vmatprep.mubr.msk.bf16.mxu1 %vm3833_vm5, %v3832_v48 }
 0x7d6   : > { %3669 = vmatprep.subr.bf16.mxu1 %v3832_v48 }
 0x7d9   : > { %3670 = vmatpush3.bf16.msra.mxu1 %v3747_v53 }
 0x7da   : > { %3671 = vmatprep.subr.bf16.mxu1 %v3832_v48 }
 0x7dd   : > { %3672 = vmatpush3.bf16.msra.mxu1 %v3748_v3 }
 0x7de   : > { %3673 = vmatprep.subr.bf16.mxu1 %v3832_v48  ;;  %v3169_v48 = vrot.slane %v4460_v39, %v3168_v28 }
 0x7e1   : > { %3674 = vmatpush3.bf16.msra.mxu1 %v3749_v22 }
 0x894   : > { %v3148_v24 = vpop.f32.mrf.mxu1 }
 0x895   : > { %v3149_v12 = vadd.f32 %v3466_v23, %v3148_v24 }
 0x896   : > { %v3665_v9 = vpop.f32.mrf.mxu1 }
 0x897   : > { %v3155_v55 = vmax.f32 %v3149_v12, 0.0 }
 0x898   : > { %v3151_v37 = vpop.f32.mrf.mxu1 }
 0x899   : > { %v3152_v14 = vadd.f32 %v3466_v23, %v3151_v37 }
 0x89a   : > { %v3666_v25 = vpop.f32.mrf.mxu1 }
 0x89b   : > { %v3156_v30 = vmax.f32 %v3152_v14, 0.0 }
 0x89d   : > { %v3157_v33 = vpack.c.bf16 %v3156_v30, %v3155_v55 }
 0x89f   : > { %3676 = vmatmul.mubr.msk.bf16.vlgmr.msra.gmra.mxu1 %vm2929_vm10, %v3157_v33 }
 0x95f   : > { %v3231_v29 = vpop.f32.mrf.mxu1 }
 0x960   : > { %v3232_v5 = vadd.f32 %v3231_v29, %v3169_v48 }
 0x961   : > { %v3677_v34 = vpop.f32.mrf.mxu1 }
 0x962   : > { %v3238_v27 = vadd.f32 %v3232_v5, %v3085_v18 }
 0x963   : > { %v3234_v38 = vpop.f32.mrf.mxu1 }
 0x964   : > { %v3235_v11 = vadd.f32 %v3234_v38, %v3169_v48  ;;  %v3240_v13 = vsel %vm684_vm4, %v3238_v27, 0.0 }
 0x965   : > { %3241 = vadd.xlane.f32.xlu0 %v3240_v13  ;;  %v3678_v40 = vpop.f32.mrf.mxu1 }
 0x966   : > { %v3239_v42 = vadd.f32 %v3235_v11, %v3086_v20 }
 0x968   : > { %v3243_v43 = vsel %vm684_vm4, %v3239_v42, 0.0 }
 0x969   : > { %3244 = vadd.xlane.f32.xlu1 %v3243_v43 }
 0x9ee   : > { %v3242_v31 = vpop.xlane.xlu0 %3241 }
 0x9ef   : > { %v3246_v44 = vmul.f32 0.03125, %v3242_v31 }
 0x9f1   : > { %v3248_v59 = vsub.f32 %v3238_v27, %v3246_v44 }
 0x9f2   : > { %v3245_v35 = vpop.xlane.xlu1 %3244 }
 0x9f3   : > { %v3247_v45 = vmul.f32 0.03125, %v3245_v35  ;;  %v3250_v46 = vmul.f32 %v3248_v59, %v3248_v59 }
 0x9f5   : > { %v3249_v47 = vsub.f32 %v3239_v42, %v3247_v45  ;;  %v3252_v49 = vsel %vm684_vm4, %v3250_v46, 0.0 }
 0x9f6   : > { %3253 = vadd.xlane.f32.xlu0 %v3252_v49 }
 0x9f7   : > { %v3251_v52 = vmul.f32 %v3249_v47, %v3249_v47 }
 0x9f9   : > { %v3255_v50 = vsel %vm684_vm4, %v3251_v52, 0.0 }
 0x9fa   : > { %3256 = vadd.xlane.f32.xlu1 %v3255_v50 }
 0xa7f   : > { %v3254_v54 = vpop.xlane.xlu0 %3253 }
 0xa80   : > { %v3258_v2 = vmul.f32 0.03125, %v3254_v54 }
 0xa82   : > { %v3260_v60 = vadd.f32 1e-05, %v3258_v2 }
 0xa83   : > { %v3257_v36 = vpop.xlane.xlu1 %3256 }
 0xa84   : > { %3786 = vrsqrt.f32 %v3260_v60  ;;  %v3259_v41 = vmul.f32 0.03125, %v3257_v36 }
 0xa86   : > { %v3261_v6 = vadd.f32 1e-05, %v3259_v41 }
 0xa88   : > { %3788 = vrsqrt.f32 %v3261_v6 }
 0xa91   : > { %v3787_v61 = vpop.eup %3786 }
 0xa92   : > { %v3264_v4 = vmul.f32 %v3787_v61, %v3248_v59 }
 0xa94   : > { %v3270_v62 = vmul.f32 %v3269_v58, %v3264_v4 }
 0xa95   : > { %v3789_v63 = vpop.eup %3788 }
 0xa96   : > { %v3276_v0 = vadd.f32 %v3275_v1, %v3270_v62  ;;  %v3265_v7 = vmul.f32 %v3789_v63, %v3249_v47 }
 0xa98   : > { %3278 = vst.msk [vmem:[#allocation2] sm:$0xff] %vm684_vm4, %v3276_v0  ;;  %v3271_v8 = vmul.f32 %v3269_v58, %v3265_v7  ;;  %3283 = sbr.rel (%p3475_p5) target bundleno = 2718 (0xa9e), region = 80 }
 0xa9a   : > { %v3277_v10 = vadd.f32 %v3275_v1, %v3271_v8 }
 0xa9c   : > { %3279 = vst.msk [vmem:[#allocation2 + $0x8] sm:$0xff] %vm684_vm4, %v3277_v10 }
 0xa9d   : > { %3284 = vst.msk [vmem:[#allocation4] sm:$0xff] %vm684_vm4, %v3276_v0  ;;  %3285 = vst.msk [vmem:[#allocation4 + $0x8] sm:$0xff] %vm684_vm4, %v3277_v10 }
 0xa9e PF: > { %p3685_p6 = scmp.eq.s32.totalorder %s3919_s26, 1  ;;  %s3840_s4 = smov [#allocation4]  }
 0xa9f   : > { %s3292_s27 = sshll.u32 %s3840_s4, 4  ;;  %s3293_s27 = int_to_ptr.vmem [resolvable:$true] %s3292_s27 }
 0xaa0   : > { %s3792_s14 = scalar_lea.vmem %s3293_s27, 256  ;;  %p3799_p10 = scmp.lt.s32.totalorder %s3293_s27, %s3293_s27 }
 0xaa1   : > { %p3793_p7 = scmp.ne.s32.totalorder %s3293_s27, %s3792_s14  ;;  %p3800_p11 = scmp.lt.s32.totalorder %s3792_s14, %s3792_s14 }
 0xaa3   : > { %p3794_p8 = pnand %p3793_p7, %p3685_p6  ;;  %p3801_p12 = por %p3800_p11, %p3799_p10 }
 0xaa5   : > { %p3795_p9 = pneg %p3794_p8 }
 0xaa7   : > { %p3802_p13 = pnand %p3801_p12, %p3795_p9 }
 0xaa9   : > { %3805 = shalt.err (!%p3802_p13)
}
 0xaaa   : > { %s3841_s28 = smov 128   ;;  %s3842_s21 = smov 8  }
 0xaab   : > { %s4545_s25 = sld [smem:[#allocation10_spill]] }
 0xab1   : > { %3682 = dma.vmem_to_hbm [thread:$0]  (%p3685_p6), %s3293_s27, 256, %s4545_s25, [#allocation5], %s3841_s28, %s3841_s28, %s3842_s21  }
 0xab2   : > { %3821 = dma.done.wait (%p3685_p6), [#allocation5], 256  }
 0xab3   : > { %3823 = vsyncadd (%p3685_p6), [#allocation5], 4294967040 }
 0xab4 PF: > { %s4546_s7 = sld [smem:[#allocation7_spill]] }
 0xaba   : > { %s24_s25 = sadd.s32 1, %s4546_s7  }
 0xabb   : > { %p21_p0 = scmp.ge.s32.totalorder %s24_s25, 4  }
 0xabd   :  { %23 = sbr.rel (!%p21_p0) target bundleno = 5 (0x5), region = 125 }
 0xac2   :  { %3308 = vsyncpa [#allocation5], 1 }
 0xac3   :  { %3310 = vsyncpa [#allocation5 + $0x1], 1 }

</bundles_post_ra>
